<compile_context>
chip_gen: v7x
topology: tpu7x:2x2x1
jax: 0.10.0
libtpu: 0.0.40
codegen_flags: <defaults>
</compile_context>

<pallas_src>
import jax
import jax.numpy as jnp
from jax.experimental import pallas as pl
from jax.experimental.pallas import tpu as pltpu

IN_FEATURES = 2048
HIDDEN = 256
OUT_FEATURES = 9


def _mlp_kernel(x_ref, w1_ref, b1_ref, w2_ref, b2_ref, o_ref):
    # Cast x to the fc1 weight dtype in-kernel (VPU work hidden under the x
    # DMA); the MXU then runs at native bf16 rate with f32 accumulation.
    x = x_ref[...].astype(w1_ref.dtype)
    h = jnp.dot(x, w1_ref[...], preferred_element_type=jnp.float32)
    h = jax.nn.sigmoid(h + b1_ref[...])          # b1 is (1, 256); broadcasts over rows
    o = jnp.dot(h, w2_ref[...], preferred_element_type=jnp.float32)
    # TODO(synk): if profiling ever shows the (tm, 9) masked store binding, pad
    # the output lane dim to 128 and slice back to 9 in the wrapper.
    o_ref[...] = jax.nn.sigmoid(o + b2_ref[...]).astype(o_ref.dtype)


def prepare_params(w1, b1, w2, b2, *, use_bf16=True):
    """One-time parameter prep (call at init, NOT per forward step).

    w1: [2048, 256], b1: [256], w2: [256, 9], b2: [9].  Weights are stored
    transposed relative to PyTorch's [out, in] layout (caller-side glue).
    """
    w1p = w1.astype(jnp.bfloat16 if use_bf16 else jnp.float32)
    b1p = b1.reshape(1, HIDDEN).astype(jnp.float32)
    w2p = w2.astype(jnp.float32)
    b2p = b2.reshape(1, OUT_FEATURES).astype(jnp.float32)
    return w1p, b1p, w2p, b2p


def _round_up(x, m):
    return ((x + m - 1) // m) * m


def _choose_tm(B, tm_max):
    """Row-tile size: large enough to amortize per-grid-step overhead, small
    enough to keep >= ~4 grid steps for large B (v7x shards "parallel" steps
    across its 2 TensorCores), rounded to a 256-row (MXU-height, (8,128)-legal)
    multiple.  For tiny batches the block equals the full batch dim (legal)."""
    cap = max(256, _round_up(-(-B // 4), 256))
    return max(1, min(tm_max, cap, B))


def _forward(x, w1, b1, w2, b2, *, tm, single_buffer_weights):
    B = x.shape[0]
    out_dtype = x.dtype

    if single_buffer_weights:
        # Constant index_map => DMA'd once; single-buffer to save VMEM headroom.
        def resident(shape):
            return pl.BlockSpec(shape, lambda i: (0, 0), pipeline_mode=pl.Buffered(1))
    else:
        def resident(shape):
            return pl.BlockSpec(shape, lambda i: (0, 0))

    # Approximate VMEM working set; only raise the scoped limit when a big
    # tile sweep actually needs it (default tiles fit every generation).
    vmem_est = (2 * tm * IN_FEATURES * x.dtype.itemsize            # x tile, 2 bufs
                + (1 if single_buffer_weights else 2) * w1.size * w1.dtype.itemsize
                + 2 * tm * HIDDEN * 4                              # fc1 activations
                + 2 * tm * OUT_FEATURES * 4)                       # output tile
    compiler_kwargs = dict(dimension_semantics=("parallel",))      # v7x: 2-TC sharding
    if vmem_est > 28 * 1024 * 1024:
        compiler_kwargs["vmem_limit_bytes"] = min(int(vmem_est * 1.5), 48 * 1024 * 1024)

    cost = pl.CostEstimate(
        flops=2 * B * IN_FEATURES * HIDDEN + 2 * B * HIDDEN * OUT_FEATURES,
        transcendentals=B * (HIDDEN + OUT_FEATURES),               # two sigmoids (EUP)
        bytes_accessed=(x.size * x.dtype.itemsize
                        + w1.size * w1.dtype.itemsize
                        + (b1.size + w2.size + b2.size) * 4
                        + B * OUT_FEATURES * jnp.dtype(out_dtype).itemsize),
    )

    return pl.pallas_call(
        _mlp_kernel,
        out_shape=jax.ShapeDtypeStruct((B, OUT_FEATURES), out_dtype),
        grid_spec=pltpu.PrefetchScalarGridSpec(
            num_scalar_prefetch=0,
            grid=(pl.cdiv(B, tm),),
            in_specs=[
                # x: row-tiled, auto double-buffered behind the fc1 matmul.
                pl.BlockSpec((tm, IN_FEATURES), lambda i: (i, 0)),
                # Weights / biases: same block every step -> loaded once, resident.
                resident((IN_FEATURES, HIDDEN)),
                resident((1, HIDDEN)),
                resident((HIDDEN, OUT_FEATURES)),
                resident((1, OUT_FEATURES)),
            ],
            out_specs=pl.BlockSpec((tm, OUT_FEATURES), lambda i: (i, 0)),
        ),
        compiler_params=pltpu.CompilerParams(**compiler_kwargs),
        cost_estimate=cost,
    )(x, w1, b1, w2, b2)


def average_instance_nonlinear(x, params, *, tm=512):
    """x: [B, 2048] (any float dtype, no pre-cast needed); params from prepare_params()."""
    w1, b1, w2, b2 = params
    tm_eff = _choose_tm(x.shape[0], tm)
    try:
        return _forward(x, w1, b1, w2, b2, tm=tm_eff, single_buffer_weights=True)
    except Exception:
        # Fallback for Pallas versions without Buffered(1) single-buffering.
        return _forward(x, w1, b1, w2, b2, tm=tm_eff, single_buffer_weights=False)


def _init_linear(key, fan_in, fan_out, dtype=jnp.float32):
    """Deterministic init mimicking nn.Linear default (uniform +/- 1/sqrt(fan_in)).

    Returns weight already transposed to [fan_in, fan_out] (PyTorch stores
    [fan_out, fan_in]; the transpose is caller-side glue, not kernel work)."""
    kw, kb = jax.random.split(key)
    bound = 1.0 / jnp.sqrt(fan_in)
    w = jax.random.uniform(kw, (fan_in, fan_out), dtype, minval=-bound, maxval=bound)
    b = jax.random.uniform(kb, (fan_out,), dtype, minval=-bound, maxval=bound)
    return w, b


if __name__ == "__main__":
    key = jax.random.PRNGKey(0)
    kx, k1, k2 = jax.random.split(key, 3)

    batch = 8
    x = jax.random.normal(kx, (batch, IN_FEATURES), dtype=jnp.float32)
    w1, b1 = _init_linear(k1, IN_FEATURES, HIDDEN)
    w2, b2 = _init_linear(k2, HIDDEN, OUT_FEATURES)

    # Pure-JAX f32 reference (same semantics as the PyTorch forward).
    ref = jax.nn.sigmoid(jax.nn.sigmoid(x @ w1 + b1) @ w2 + b2)

    # bf16-fc1 fast path (default): params prepared ONCE, outside the hot path;
    # x stays f32 and is cast in-kernel.  Tolerance covers bf16 rounding
    # (double sigmoid saturates, so error stays small).
    params_bf16 = prepare_params(w1, b1, w2, b2, use_bf16=True)
    out = jax.block_until_ready(average_instance_nonlinear(x, params_bf16))
    assert out.shape == (batch, OUT_FEATURES)
    assert jnp.allclose(out, ref, atol=2e-2, rtol=2e-2)

    # Full-precision path: tight check.
    params_f32 = prepare_params(w1, b1, w2, b2, use_bf16=False)
    out_f32 = jax.block_until_ready(average_instance_nonlinear(x, params_f32))
    assert jnp.allclose(out_f32, ref, atol=1e-5, rtol=1e-5)

    print("KERNEL_OK")
</pallas_src>

<mosaic_0001>
module attributes {stable_mosaic.version = 11 : i64} {
  func.func @_mlp_kernel(%arg0: i32, %arg1: memref<8x2048xf32, #tpu.memory_space<vmem>>, %arg2: memref<2048x256xbf16, #tpu.memory_space<vmem>>, %arg3: memref<1x256xf32, #tpu.memory_space<vmem>>, %arg4: memref<256x9xf32, #tpu.memory_space<vmem>>, %arg5: memref<1x9xf32, #tpu.memory_space<vmem>>, %arg6: memref<8x9xf32, #tpu.memory_space<vmem>>) attributes {dimension_semantics = [#tpu.dimension_semantics<parallel>], iteration_bounds = array<i64: 1>, scalar_prefetch = 0 : i64, scratch_operands = 0 : i64, tpu.core_type = #tpu.core_type<tc>, window_params = [{transform_indices = @transform_0, window_bounds = array<i64: 8, 2048>}, {pipeline_mode = #tpu.pipeline_mode<synchronous>, transform_indices = @transform_1, window_bounds = array<i64: 2048, 256>}, {pipeline_mode = #tpu.pipeline_mode<synchronous>, transform_indices = @transform_2, window_bounds = array<i64: 1, 256>}, {pipeline_mode = #tpu.pipeline_mode<synchronous>, transform_indices = @transform_3, window_bounds = array<i64: 256, 9>}, {pipeline_mode = #tpu.pipeline_mode<synchronous>, transform_indices = @transform_4, window_bounds = array<i64: 1, 9>}, {transform_indices = @transform_5, window_bounds = array<i64: 8, 9>}]} {
    %c0 = arith.constant 0 : index
    %c0_0 = arith.constant 0 : index
    %0 = vector.load %arg1[%c0, %c0_0] : memref<8x2048xf32, #tpu.memory_space<vmem>>, vector<8x2048xf32>
    %1 = arith.truncf %0 : vector<8x2048xf32> to vector<8x2048xbf16>
    %c0_1 = arith.constant 0 : index
    %c0_2 = arith.constant 0 : index
    %2 = vector.load %arg2[%c0_1, %c0_2] : memref<2048x256xbf16, #tpu.memory_space<vmem>>, vector<2048x256xbf16>
    %cst = arith.constant dense<0.000000e+00> : vector<8x256xf32>
    %3 = tpu.matmul %1, %2, %cst {dimension_numbers = #tpu.dot_dimension_numbers<[1], [0], [0], [1], [0, 0, 1, 1], [], []>} : vector<8x2048xbf16>, vector<2048x256xbf16>, vector<8x256xf32> -> vector<8x256xf32>
    %c0_3 = arith.constant 0 : index
    %c0_4 = arith.constant 0 : index
    %4 = vector.load %arg3[%c0_3, %c0_4] : memref<1x256xf32, #tpu.memory_space<vmem>>, vector<1x256xf32>
    %5 = vector.broadcast %4 : vector<1x256xf32> to vector<8x256xf32>
    %6 = arith.addf %3, %5 : vector<8x256xf32>
    %7 = arith.negf %6 : vector<8x256xf32>
    %8 = math.exp %7 : vector<8x256xf32>
    %cst_5 = arith.constant 1.000000e+00 : f32
    %9 = vector.broadcast %cst_5 : f32 to vector<8x256xf32>
    %10 = arith.addf %9, %8 : vector<8x256xf32>
    %11 = arith.divf %9, %10 : vector<8x256xf32>
    %c0_6 = arith.constant 0 : index
    %c0_7 = arith.constant 0 : index
    %12 = vector.load %arg4[%c0_6, %c0_7] : memref<256x9xf32, #tpu.memory_space<vmem>>, vector<256x9xf32>
    %cst_8 = arith.constant dense<0.000000e+00> : vector<8x9xf32>
    %13 = tpu.matmul %11, %12, %cst_8 {dimension_numbers = #tpu.dot_dimension_numbers<[1], [0], [0], [1], [0, 0, 1, 1], [], []>} : vector<8x256xf32>, vector<256x9xf32>, vector<8x9xf32> -> vector<8x9xf32>
    %c0_9 = arith.constant 0 : index
    %c0_10 = arith.constant 0 : index
    %14 = vector.load %arg5[%c0_9, %c0_10] : memref<1x9xf32, #tpu.memory_space<vmem>>, vector<1x9xf32>
    %15 = vector.broadcast %14 : vector<1x9xf32> to vector<8x9xf32>
    %16 = arith.addf %13, %15 : vector<8x9xf32>
    %17 = arith.negf %16 : vector<8x9xf32>
    %18 = math.exp %17 : vector<8x9xf32>
    %cst_11 = arith.constant 1.000000e+00 : f32
    %19 = vector.broadcast %cst_11 : f32 to vector<8x9xf32>
    %20 = arith.addf %19, %18 : vector<8x9xf32>
    %21 = arith.divf %19, %20 : vector<8x9xf32>
    %c0_12 = arith.constant 0 : index
    %c0_13 = arith.constant 0 : index
    %22 = vector.load %arg6[%c0_12, %c0_13] : memref<8x9xf32, #tpu.memory_space<vmem>>, vector<8x9xf32>
    tpu.vector_store %arg6[%c0_12, %c0_13], %21 {strides = array<i32>} : memref<8x9xf32, #tpu.memory_space<vmem>>, vector<8x9xf32>,
    return
  }
  func.func @transform_0(%arg0: i32) -> (i32, i32) {
    %c0_i32 = arith.constant 0 : i32
    %c0_i32_0 = arith.constant 0 : i32
    return %arg0, %c0_i32 : i32, i32
  }
  func.func @transform_1(%arg0: i32) -> (i32, i32) {
    %c0_i32 = arith.constant 0 : i32
    %c0_i32_0 = arith.constant 0 : i32
    %c0_i32_1 = arith.constant 0 : i32
    return %c0_i32, %c0_i32_0 : i32, i32
  }
  func.func @transform_2(%arg0: i32) -> (i32, i32) {
    %c0_i32 = arith.constant 0 : i32
    %c0_i32_0 = arith.constant 0 : i32
    %c0_i32_1 = arith.constant 0 : i32
    return %c0_i32, %c0_i32_0 : i32, i32
  }
  func.func @transform_3(%arg0: i32) -> (i32, i32) {
    %c0_i32 = arith.constant 0 : i32
    %c0_i32_0 = arith.constant 0 : i32
    %c0_i32_1 = arith.constant 0 : i32
    return %c0_i32, %c0_i32_0 : i32, i32
  }
  func.func @transform_4(%arg0: i32) -> (i32, i32) {
    %c0_i32 = arith.constant 0 : i32
    %c0_i32_0 = arith.constant 0 : i32
    %c0_i32_1 = arith.constant 0 : i32
    return %c0_i32, %c0_i32_0 : i32, i32
  }
  func.func @transform_5(%arg0: i32) -> (i32, i32) {
    %c0_i32 = arith.constant 0 : i32
    %c0_i32_0 = arith.constant 0 : i32
    return %arg0, %c0_i32 : i32, i32
  }
}

module attributes {stable_mosaic.version = 11 : i64} {
  func.func @_mlp_kernel(%arg0: i32, %arg1: memref<8x2048xf32, #tpu.memory_space<vmem>>, %arg2: memref<2048x256xbf16, #tpu.memory_space<vmem>>, %arg3: memref<1x256xf32, #tpu.memory_space<vmem>>, %arg4: memref<256x9xf32, #tpu.memory_space<vmem>>, %arg5: memref<1x9xf32, #tpu.memory_space<vmem>>, %arg6: memref<8x9xf32, #tpu.memory_space<vmem>>) attributes {dimension_semantics = [#tpu.dimension_semantics<parallel>], iteration_bounds = array<i64: 1>, scalar_prefetch = 0 : i64, scratch_operands = 0 : i64, tpu.core_type = #tpu.core_type<tc>, window_params = [{transform_indices = @transform_0, window_bounds = array<i64: 8, 2048>}, {pipeline_mode = #tpu.pipeline_mode<synchronous>, transform_indices = @transform_1, window_bounds = array<i64: 2048, 256>}, {pipeline_mode = #tpu.pipeline_mode<synchronous>, transform_indices = @transform_2, window_bounds = array<i64: 1, 256>}, {pipeline_mode = #tpu.pipeline_mode<synchronous>, transform_indices = @transform_3, window_bounds = array<i64: 256, 9>}, {pipeline_mode = #tpu.pipeline_mode<synchronous>, transform_indices = @transform_4, window_bounds = array<i64: 1, 9>}, {transform_indices = @transform_5, window_bounds = array<i64: 8, 9>}]} {
    %c0 = arith.constant 0 : index
    %c0_0 = arith.constant 0 : index
    %0 = vector.load %arg1[%c0, %c0_0] : memref<8x2048xf32, #tpu.memory_space<vmem>>, vector<8x2048xf32>
    %1 = arith.truncf %0 : vector<8x2048xf32> to vector<8x2048xbf16>
    %c0_1 = arith.constant 0 : index
    %c0_2 = arith.constant 0 : index
    %2 = vector.load %arg2[%c0_1, %c0_2] : memref<2048x256xbf16, #tpu.memory_space<vmem>>, vector<2048x256xbf16>
    %cst = arith.constant dense<0.000000e+00> : vector<8x256xf32>
    %3 = tpu.matmul %1, %2, %cst {dimension_numbers = #tpu.dot_dimension_numbers<[1], [0], [0], [1], [0, 0, 1, 1], [], []>} : vector<8x2048xbf16>, vector<2048x256xbf16>, vector<8x256xf32> -> vector<8x256xf32>
    %c0_3 = arith.constant 0 : index
    %c0_4 = arith.constant 0 : index
    %4 = vector.load %arg3[%c0_3, %c0_4] : memref<1x256xf32, #tpu.memory_space<vmem>>, vector<1x256xf32>
    %5 = vector.broadcast %4 : vector<1x256xf32> to vector<8x256xf32>
    %6 = arith.addf %3, %5 : vector<8x256xf32>
    %7 = arith.negf %6 : vector<8x256xf32>
    %8 = math.exp %7 : vector<8x256xf32>
    %cst_5 = arith.constant 1.000000e+00 : f32
    %9 = vector.broadcast %cst_5 : f32 to vector<8x256xf32>
    %10 = arith.addf %9, %8 : vector<8x256xf32>
    %11 = arith.divf %9, %10 : vector<8x256xf32>
    %c0_6 = arith.constant 0 : index
    %c0_7 = arith.constant 0 : index
    %12 = vector.load %arg4[%c0_6, %c0_7] : memref<256x9xf32, #tpu.memory_space<vmem>>, vector<256x9xf32>
    %cst_8 = arith.constant dense<0.000000e+00> : vector<8x9xf32>
    %13 = tpu.matmul %11, %12, %cst_8 {dimension_numbers = #tpu.dot_dimension_numbers<[1], [0], [0], [1], [0, 0, 1, 1], [], []>} : vector<8x256xf32>, vector<256x9xf32>, vector<8x9xf32> -> vector<8x9xf32>
    %c0_9 = arith.constant 0 : index
    %c0_10 = arith.constant 0 : index
    %14 = vector.load %arg5[%c0_9, %c0_10] : memref<1x9xf32, #tpu.memory_space<vmem>>, vector<1x9xf32>
    %15 = vector.broadcast %14 : vector<1x9xf32> to vector<8x9xf32>
    %16 = arith.addf %13, %15 : vector<8x9xf32>
    %17 = arith.negf %16 : vector<8x9xf32>
    %18 = math.exp %17 : vector<8x9xf32>
    %cst_11 = arith.constant 1.000000e+00 : f32
    %19 = vector.broadcast %cst_11 : f32 to vector<8x9xf32>
    %20 = arith.addf %19, %18 : vector<8x9xf32>
    %21 = arith.divf %19, %20 : vector<8x9xf32>
    %c0_12 = arith.constant 0 : index
    %c0_13 = arith.constant 0 : index
    %22 = vector.load %arg6[%c0_12, %c0_13] : memref<8x9xf32, #tpu.memory_space<vmem>>, vector<8x9xf32>
    tpu.vector_store %arg6[%c0_12, %c0_13], %21 {strides = array<i32>} : memref<8x9xf32, #tpu.memory_space<vmem>>, vector<8x9xf32>,
    return
  }
  func.func @transform_0(%arg0: i32) -> (i32, i32) {
    %c0_i32 = arith.constant 0 : i32
    %c0_i32_0 = arith.constant 0 : i32
    return %arg0, %c0_i32 : i32, i32
  }
  func.func @transform_1(%arg0: i32) -> (i32, i32) {
    %c0_i32 = arith.constant 0 : i32
    %c0_i32_0 = arith.constant 0 : i32
    %c0_i32_1 = arith.constant 0 : i32
    return %c0_i32, %c0_i32_0 : i32, i32
  }
  func.func @transform_2(%arg0: i32) -> (i32, i32) {
    %c0_i32 = arith.constant 0 : i32
    %c0_i32_0 = arith.constant 0 : i32
    %c0_i32_1 = arith.constant 0 : i32
    return %c0_i32, %c0_i32_0 : i32, i32
  }
  func.func @transform_3(%arg0: i32) -> (i32, i32) {
    %c0_i32 = arith.constant 0 : i32
    %c0_i32_0 = arith.constant 0 : i32
    %c0_i32_1 = arith.constant 0 : i32
    return %c0_i32, %c0_i32_0 : i32, i32
  }
  func.func @transform_4(%arg0: i32) -> (i32, i32) {
    %c0_i32 = arith.constant 0 : i32
    %c0_i32_0 = arith.constant 0 : i32
    %c0_i32_1 = arith.constant 0 : i32
    return %c0_i32, %c0_i32_0 : i32, i32
  }
  func.func @transform_5(%arg0: i32) -> (i32, i32) {
    %c0_i32 = arith.constant 0 : i32
    %c0_i32_0 = arith.constant 0 : i32
    return %arg0, %c0_i32 : i32, i32
  }
}

</mosaic_0001>

<bundles_post_ra>
// kernel: tpu_custom_call.1
= control target key start
LH: loop header
LB: loop body
LE: loop exit
PB: predicated region body
PF: predicated region fallthrough
CT: control target
= control target key end

     0   :  { %10 = vsyncpa [#allocation3], 0  ;;  %s3098_s0 = inlined_call_operand.vmem [shape: f32[8,2048], index: 0, kind: input, shape index: {}]   ;;  %s3099_s1 = inlined_call_operand.hbm [shape: bf16[2048,256], index: 1, kind: input, shape index: {}]   ;;  %s3100_s2 = inlined_call_operand.vmem [shape: f32[1,256], index: 2, kind: input, shape index: {}]   ;;  %s3101_s3 = inlined_call_operand.vmem [shape: f32[256,9], index: 3, kind: input, shape index: {}]   ;;  %s3102_s4 = inlined_call_operand.vmem [shape: f32[1,9], index: 4, kind: input, shape index: {}]   ;;  %s3103_s5 = inlined_call_operand.hbm [shape: f32[8,9], index: 5, kind: output, shape index: {}]  }
   0x1   :  { %11 = vsyncpa [#allocation4], 0  ;;  %s2890_s18 = smov [#allocation2]   ;;  %s2842_s22 = scalar_lea.hbm %s3099_s1, 32768 }
   0x2   :  { %s19_s19 = sshll.u32 %s2890_s18, 4  ;;  %p2843_p0 = scmp.ne.s32.totalorder %s3099_s1, %s2842_s22  ;;  %s20_s19 = int_to_ptr.vmem [resolvable:$true] %s19_s19 }
   0x3   :  { %p2846_p1 = scmp.lt.u32.totalorder %s2842_s22, %s3099_s1 }
   0x5   :  { %p2848_p2 = pnand %p2846_p1, %p2843_p0 }
   0x7   :  { %2851 = shalt.err (!%p2848_p2)
}
   0x8   :  { %s2852_s27 = scalar_lea.vmem %s20_s19, 32768  ;;  %p2857_p4 = scmp.lt.s32.totalorder %s20_s19, %s20_s19 }
   0x9   :  { %p2853_p3 = scmp.ne.s32.totalorder %s20_s19, %s2852_s27  ;;  %p2858_p5 = scmp.lt.s32.totalorder %s2852_s27, %s2852_s27 }
   0xb   :  { %p2859_p6 = por %p2858_p5, %p2857_p4 }
   0xd   :  { %p2860_p7 = pnand %p2859_p6, %p2853_p3 }
   0xf   :  { %2863 = shalt.err (!%p2860_p7)
}
  0x10   :  { %s2891_s28 = smov 128   ;;  %s2892_s29 = smov 8  }
  0x11   :  { %25 = dma.hbm_to_vmem [thread:$0]  %s3099_s1, 32768, %s20_s19, [#allocation3], %s2891_s28, %s2891_s28, %s2892_s29  }
  0x12   :  { %2886 = dma.done.wait [#allocation3], 32768  }
  0x13   :  { %2887 = vsyncadd [#allocation3], 4294934528  ;;  %v2446_v0 = vld [vmem:[#allocation2 + $0x4] ss:$8 sps:$4 sm:$0xff]   ;;  %v2450_v2 = vld [vmem:[#allocation2] ss:$8 sps:$4 sm:$0xff]  }
  0x14   :  { %v2448_v1 = vld [vmem:[#allocation2 + $0x404] ss:$8 sps:$4 sm:$0xff]   ;;  %1615 = vmatprep.subr.bf16.mxu1 %v2446_v0  ;;  %v2451_v3 = vld [vmem:[#allocation2 + $0x400] ss:$8 sps:$4 sm:$0xff]   ;;  %v2452_v4 = vld [vmem:[#allocation2 + $0x14] ss:$8 sps:$4 sm:$0xff]  }
  0x15   :  { %1779 = vmatprep.subr.bf16.mxu0 %v2448_v1  ;;  %1616 = vmatpush1.bf16.msra.mxu1 %v2450_v2  ;;  %v2454_v5 = vld [vmem:[#allocation2 + $0x414] ss:$8 sps:$4 sm:$0xff]   ;;  %v2456_v6 = vld [vmem:[#allocation2 + $0x10] ss:$8 sps:$4 sm:$0xff]   ;;  %v2458_v8 = vld [vmem:[#allocation2 + $0x24] ss:$8 sps:$4 sm:$0xff]  }
  0x16   :  { %1780 = vmatpush1.bf16.msra.mxu0 %v2451_v3  ;;  %1617 = vmatprep.subr.bf16.mxu1 %v2452_v4  ;;  %v2457_v7 = vld [vmem:[#allocation2 + $0x410] ss:$8 sps:$4 sm:$0xff]   ;;  %v2460_v9 = vld [vmem:[#allocation2 + $0x424] ss:$8 sps:$4 sm:$0xff]   ;;  %v2462_v10 = vld [vmem:[#allocation2 + $0x20] ss:$8 sps:$4 sm:$0xff]  }
  0x17   :  { %1781 = vmatprep.subr.bf16.mxu0 %v2454_v5  ;;  %v2463_v11 = vld [vmem:[#allocation2 + $0x420] ss:$8 sps:$4 sm:$0xff]   ;;  %v2464_v12 = vld [vmem:[#allocation2 + $0x34] ss:$8 sps:$4 sm:$0xff]   ;;  %v2468_v14 = vld [vmem:[#allocation2 + $0x30] ss:$8 sps:$4 sm:$0xff]  }
  0x18   :  { %v2466_v13 = vld [vmem:[#allocation2 + $0x434] ss:$8 sps:$4 sm:$0xff]   ;;  %v2469_v15 = vld [vmem:[#allocation2 + $0x430] ss:$8 sps:$4 sm:$0xff]   ;;  %v2470_v16 = vld [vmem:[#allocation2 + $0x44] ss:$8 sps:$4 sm:$0xff]  }
  0x19   :  { %1618 = vmatpush1.bf16.msra.mxu1 %v2456_v6  ;;  %v2472_v17 = vld [vmem:[#allocation2 + $0x444] ss:$8 sps:$4 sm:$0xff]   ;;  %v2474_v18 = vld [vmem:[#allocation2 + $0x40] ss:$8 sps:$4 sm:$0xff]   ;;  %v2476_v20 = vld [vmem:[#allocation2 + $0x54] ss:$8 sps:$4 sm:$0xff]  }
  0x1a   :  { %1782 = vmatpush1.bf16.msra.mxu0 %v2457_v7  ;;  %1619 = vmatprep.subr.bf16.mxu1 %v2458_v8  ;;  %v2475_v19 = vld [vmem:[#allocation2 + $0x440] ss:$8 sps:$4 sm:$0xff]   ;;  %v2478_v21 = vld [vmem:[#allocation2 + $0x454] ss:$8 sps:$4 sm:$0xff]   ;;  %v2480_v22 = vld [vmem:[#allocation2 + $0x50] ss:$8 sps:$4 sm:$0xff]  }
  0x1b   :  { %1783 = vmatprep.subr.bf16.mxu0 %v2460_v9  ;;  %v2481_v23 = vld [vmem:[#allocation2 + $0x450] ss:$8 sps:$4 sm:$0xff]   ;;  %v2482_v24 = vld [vmem:[#allocation2 + $0x64] ss:$8 sps:$4 sm:$0xff]   ;;  %v2486_v26 = vld [vmem:[#allocation2 + $0x60] ss:$8 sps:$4 sm:$0xff]  }
  0x1c   :  { %v2484_v25 = vld [vmem:[#allocation2 + $0x464] ss:$8 sps:$4 sm:$0xff]   ;;  %v2487_v27 = vld [vmem:[#allocation2 + $0x460] ss:$8 sps:$4 sm:$0xff]   ;;  %v2488_v28 = vld [vmem:[#allocation2 + $0x74] ss:$8 sps:$4 sm:$0xff]  }
  0x1d   :  { %1620 = vmatpush1.bf16.msra.mxu1 %v2462_v10  ;;  %v2490_v29 = vld [vmem:[#allocation2 + $0x474] ss:$8 sps:$4 sm:$0xff]   ;;  %v2492_v30 = vld [vmem:[#allocation2 + $0x70] ss:$8 sps:$4 sm:$0xff]   ;;  %v2494_v32 = vld [vmem:[#allocation2 + $0x84] ss:$8 sps:$4 sm:$0xff]  }
  0x1e   :  { %1784 = vmatpush1.bf16.msra.mxu0 %v2463_v11  ;;  %1621 = vmatprep.subr.bf16.mxu1 %v2464_v12  ;;  %v2493_v31 = vld [vmem:[#allocation2 + $0x470] ss:$8 sps:$4 sm:$0xff]   ;;  %v2496_v33 = vld [vmem:[#allocation2 + $0x484] ss:$8 sps:$4 sm:$0xff]   ;;  %v2498_v34 = vld [vmem:[#allocation2 + $0x80] ss:$8 sps:$4 sm:$0xff]  }
  0x1f   :  { %1785 = vmatprep.subr.bf16.mxu0 %v2466_v13  ;;  %v2499_v35 = vld [vmem:[#allocation2 + $0x480] ss:$8 sps:$4 sm:$0xff]   ;;  %v2500_v36 = vld [vmem:[#allocation2 + $0x94] ss:$8 sps:$4 sm:$0xff]   ;;  %v2504_v38 = vld [vmem:[#allocation2 + $0x90] ss:$8 sps:$4 sm:$0xff]  }
  0x20   :  { %v2502_v37 = vld [vmem:[#allocation2 + $0x494] ss:$8 sps:$4 sm:$0xff]   ;;  %v2505_v39 = vld [vmem:[#allocation2 + $0x490] ss:$8 sps:$4 sm:$0xff]   ;;  %v2506_v40 = vld [vmem:[#allocation2 + $0xa4] ss:$8 sps:$4 sm:$0xff]  }
  0x21   :  { %1622 = vmatpush1.bf16.msra.mxu1 %v2468_v14  ;;  %v2508_v41 = vld [vmem:[#allocation2 + $0x4a4] ss:$8 sps:$4 sm:$0xff]   ;;  %v2510_v42 = vld [vmem:[#allocation2 + $0xa0] ss:$8 sps:$4 sm:$0xff]   ;;  %v2512_v44 = vld [vmem:[#allocation2 + $0xb4] ss:$8 sps:$4 sm:$0xff]  }
  0x22   :  { %1786 = vmatpush1.bf16.msra.mxu0 %v2469_v15  ;;  %1623 = vmatprep.subr.bf16.mxu1 %v2470_v16  ;;  %v2511_v43 = vld [vmem:[#allocation2 + $0x4a0] ss:$8 sps:$4 sm:$0xff]   ;;  %v2514_v45 = vld [vmem:[#allocation2 + $0x4b4] ss:$8 sps:$4 sm:$0xff]   ;;  %v2516_v47 = vld [vmem:[#allocation2 + $0xb0] ss:$8 sps:$4 sm:$0xff]  }
  0x23   :  { %1787 = vmatprep.subr.bf16.mxu0 %v2472_v17  ;;  %v36_v46 = vld [vmem:[%s3098_s0 + $0x8] sm:$0xff]  ;;  %v2517_v49 = vld [vmem:[#allocation2 + $0x4b0] ss:$8 sps:$4 sm:$0xff]   ;;  %v2524_v56 = vld [vmem:[#allocation2 + $0xd4] ss:$8 sps:$4 sm:$0xff]   ;;  %s2893_s23 = smov [#allocation5]  }
  0x24   :  { %v52_v48 = vpack.c.bf16 %v36_v46, %v36_v46  ;;  %v44_v50 = vld [vmem:[%s3098_s0 + $0x48] sm:$0xff]  ;;  %v2526_v57 = vld [vmem:[#allocation2 + $0x4d4] ss:$8 sps:$4 sm:$0xff]   ;;  %v2528_v58 = vld [vmem:[#allocation2 + $0xd0] ss:$8 sps:$4 sm:$0xff]   ;;  %s2078_s24 = sshll.u32 %s2893_s23, 4  ;;  %s2079_s24 = int_to_ptr.vmem [resolvable:$true] %s2078_s24 }
  0x25   :  { %1624 = vmatpush1.bf16.msra.mxu1 %v2474_v18  ;;  %v2518_v51 = vld [vmem:[#allocation2 + $0xc4] ss:$8 sps:$4 sm:$0xff]   ;;  %v60_v53 = vpack.c.bf16 %v44_v50, %v44_v50  ;;  %v2522_v54 = vld [vmem:[#allocation2 + $0xc0] ss:$8 sps:$4 sm:$0xff]   ;;  %v2529_v59 = vld [vmem:[#allocation2 + $0x4d0] ss:$8 sps:$4 sm:$0xff]   ;;  %p2869_p9 = scmp.lt.s32.totalorder %s2079_s24, %s2079_s24 }
  0x26   :  { %1788 = vmatpush1.bf16.msra.mxu0 %v2475_v19  ;;  %1625 = vmatprep.subr.bf16.mxu1 %v2476_v20  ;;  %v2520_v52 = vld [vmem:[#allocation2 + $0x4c4] ss:$8 sps:$4 sm:$0xff]   ;;  %v2523_v55 = vld [vmem:[#allocation2 + $0x4c0] ss:$8 sps:$4 sm:$0xff]   ;;  %v2536_v0 = vld [vmem:[#allocation2 + $0xf4] ss:$8 sps:$4 sm:$0xff]  }
  0x27   :  { %1789 = vmatprep.subr.bf16.mxu0 %v2478_v21  ;;  %1647 = vmatprep.mubr.bf16.mxu1 %v52_v48  ;;  %v2530_v60 = vld [vmem:[#allocation2 + $0xe4] ss:$8 sps:$4 sm:$0xff]   ;;  %v2534_v62 = vld [vmem:[#allocation2 + $0xe0] ss:$8 sps:$4 sm:$0xff]   ;;  %v2538_v1 = vld [vmem:[#allocation2 + $0x4f4] ss:$8 sps:$4 sm:$0xff]  }
  0x28   :  { %1811 = vmatprep.mubr.bf16.mxu0 %v60_v53  ;;  %v2532_v61 = vld [vmem:[#allocation2 + $0x4e4] ss:$8 sps:$4 sm:$0xff]   ;;  %v2535_v63 = vld [vmem:[#allocation2 + $0x4e0] ss:$8 sps:$4 sm:$0xff]   ;;  %v2540_v2 = vld [vmem:[#allocation2 + $0xf0] ss:$8 sps:$4 sm:$0xff]  }
  0x29   :  { %1626 = vmatpush1.bf16.msra.mxu1 %v2480_v22  ;;  %v2541_v3 = vld [vmem:[#allocation2 + $0x4f0] ss:$8 sps:$4 sm:$0xff]   ;;  %v2544_v4 = vld [vmem:[#allocation2 + $0x104] ss:$8 sps:$4 sm:$0xff]   ;;  %v2542_v8 = vld [vmem:[#allocation2 + $0x100] ss:$8 sps:$4 sm:$0xff]  }
  0x2a   :  { %1790 = vmatpush1.bf16.msra.mxu0 %v2481_v23  ;;  %1627 = vmatprep.subr.bf16.mxu1 %v2482_v24  ;;  %v35_v5 = vld [vmem:[%s3098_s0] sm:$0xff]  ;;  %v2550_v12 = vld [vmem:[#allocation2 + $0x114] ss:$8 sps:$4 sm:$0xff]   ;;  %v2548_v14 = vld [vmem:[#allocation2 + $0x110] ss:$8 sps:$4 sm:$0xff]   ;;  %vm2070_vm0 = vcmask 72704  }
  0x2b   :  { %1791 = vmatprep.subr.bf16.mxu0 %v2484_v25  ;;  %v43_v6 = vld [vmem:[%s3098_s0 + $0x40] sm:$0xff]  ;;  %v51_v10 = vpack.c.bf16 %v35_v5, %v35_v5  ;;  %v2553_v13 = vld [vmem:[#allocation2 + $0x514] ss:$8 sps:$4 sm:$0xff]   ;;  %v2551_v15 = vld [vmem:[#allocation2 + $0x510] ss:$8 sps:$4 sm:$0xff]   ;;  %s2864_s25 = scalar_lea.vmem %s2079_s24, 128 }
  0x2c   :  { %v2547_v7 = vld [vmem:[#allocation2 + $0x504] ss:$8 sps:$4 sm:$0xff]   ;;  %v2545_v9 = vld [vmem:[#allocation2 + $0x500] ss:$8 sps:$4 sm:$0xff]   ;;  %v59_v11 = vpack.c.bf16 %v43_v6, %v43_v6  ;;  %v2562_v20 = vld [vmem:[#allocation2 + $0x134] ss:$8 sps:$4 sm:$0xff]   ;;  %p2865_p8 = scmp.ne.s32.totalorder %s2079_s24, %s2864_s25  ;;  %p2870_p10 = scmp.lt.s32.totalorder %s2864_s25, %s2864_s25 }
  0x2d   :  { %1628 = vmatpush1.bf16.msra.mxu1 %v2486_v26  ;;  %v2556_v16 = vld [vmem:[#allocation2 + $0x124] ss:$8 sps:$4 sm:$0xff]   ;;  %v2554_v18 = vld [vmem:[#allocation2 + $0x120] ss:$8 sps:$4 sm:$0xff]   ;;  %v2565_v21 = vld [vmem:[#allocation2 + $0x534] ss:$8 sps:$4 sm:$0xff]  }
  0x2e   :  { %1792 = vmatpush1.bf16.msra.mxu0 %v2487_v27  ;;  %1629 = vmatprep.subr.bf16.mxu1 %v2488_v28  ;;  %v2559_v17 = vld [vmem:[#allocation2 + $0x524] ss:$8 sps:$4 sm:$0xff]   ;;  %v2557_v19 = vld [vmem:[#allocation2 + $0x520] ss:$8 sps:$4 sm:$0xff]   ;;  %v2560_v22 = vld [vmem:[#allocation2 + $0x130] ss:$8 sps:$4 sm:$0xff]   ;;  %p2871_p11 = por %p2870_p10, %p2869_p9 }
  0x2f   :  { %1793 = vmatprep.subr.bf16.mxu0 %v2490_v29  ;;  %v2563_v23 = vld [vmem:[#allocation2 + $0x530] ss:$8 sps:$4 sm:$0xff]   ;;  %v2568_v24 = vld [vmem:[#allocation2 + $0x144] ss:$8 sps:$4 sm:$0xff]   ;;  %v2566_v26 = vld [vmem:[#allocation2 + $0x140] ss:$8 sps:$4 sm:$0xff]  }
  0x30   :  { %v2571_v25 = vld [vmem:[#allocation2 + $0x544] ss:$8 sps:$4 sm:$0xff]   ;;  %v2569_v27 = vld [vmem:[#allocation2 + $0x540] ss:$8 sps:$4 sm:$0xff]   ;;  %v2574_v28 = vld [vmem:[#allocation2 + $0x154] ss:$8 sps:$4 sm:$0xff]   ;;  %p2872_p12 = pnand %p2871_p11, %p2865_p8 }
  0x31   :  { %1630 = vmatpush1.bf16.msra.mxu1 %v2492_v30  ;;  %v2577_v29 = vld [vmem:[#allocation2 + $0x554] ss:$8 sps:$4 sm:$0xff]   ;;  %v2572_v30 = vld [vmem:[#allocation2 + $0x150] ss:$8 sps:$4 sm:$0xff]   ;;  %v2590_v46 = vld [vmem:[#allocation2 + $0x180] ss:$8 sps:$4 sm:$0xff]  }
  0x32   :  { %1794 = vmatpush1.bf16.msra.mxu0 %v2493_v31  ;;  %1631 = vmatprep.subr.bf16.mxu1 %v2494_v32  ;;  %v2575_v31 = vld [vmem:[#allocation2 + $0x550] ss:$8 sps:$4 sm:$0xff]   ;;  %v2580_v32 = vld [vmem:[#allocation2 + $0x164] ss:$8 sps:$4 sm:$0xff]   ;;  %v2598_v48 = vld [vmem:[#allocation2 + $0x194] ss:$8 sps:$4 sm:$0xff]  }
  0x33   :  { %1795 = vmatprep.subr.bf16.mxu0 %v2496_v33  ;;  %v2583_v33 = vld [vmem:[#allocation2 + $0x564] ss:$8 sps:$4 sm:$0xff]   ;;  %v2596_v50 = vld [vmem:[#allocation2 + $0x190] ss:$8 sps:$4 sm:$0xff]   ;;  %v2626_v6 = vld [vmem:[#allocation2 + $0x1e0] ss:$8 sps:$4 sm:$0xff]  }
  0x34   :  { %v2607_v53 = vld [vmem:[#allocation2 + $0x5a4] ss:$8 sps:$4 sm:$0xff]  }
  0x35   :  { %1632 = vmatpush1.bf16.msra.mxu1 %v2498_v34  ;;  %v38_v34 = vld [vmem:[%s3098_s0 + $0x18] sm:$0xff]  ;;  %v2631_v5 = vld [vmem:[#allocation2 + $0x5e4] ss:$8 sps:$4 sm:$0xff]  }
  0x36   :  { %1796 = vmatpush1.bf16.msra.mxu0 %v2499_v35  ;;  %1633 = vmatprep.subr.bf16.mxu1 %v2500_v36  ;;  %v2578_v35 = vld [vmem:[#allocation2 + $0x160] ss:$8 sps:$4 sm:$0xff]   ;;  %v54_v36 = vpack.c.bf16 %v38_v34, %v38_v34  ;;  %v2656_v34 = vld [vmem:[#allocation2 + $0x230] ss:$8 sps:$4 sm:$0xff]  }
  0x37   :  { %1797 = vmatprep.subr.bf16.mxu0 %v2502_v37  ;;  %v2581_v37 = vld [vmem:[#allocation2 + $0x560] ss:$8 sps:$4 sm:$0xff]  }
  0x39   :  { %1634 = vmatpush1.bf16.msra.mxu1 %v2504_v38  ;;  %v46_v38 = vld [vmem:[%s3098_s0 + $0x58] sm:$0xff] }
  0x3a   :  { %1798 = vmatpush1.bf16.msra.mxu0 %v2505_v39  ;;  %1635 = vmatprep.subr.bf16.mxu1 %v2506_v40  ;;  %v2586_v39 = vld [vmem:[#allocation2 + $0x174] ss:$8 sps:$4 sm:$0xff]  }
  0x3b   :  { %1799 = vmatprep.subr.bf16.mxu0 %v2508_v41  ;;  %v2589_v40 = vld [vmem:[#allocation2 + $0x574] ss:$8 sps:$4 sm:$0xff]   ;;  %v62_v41 = vpack.c.bf16 %v46_v38, %v46_v38  ;;  %v2662_v38 = vld [vmem:[#allocation2 + $0x240] ss:$8 sps:$4 sm:$0xff]  }
  0x3d   :  { %1636 = vmatpush1.bf16.msra.mxu1 %v2510_v42  ;;  %v2584_v42 = vld [vmem:[#allocation2 + $0x170] ss:$8 sps:$4 sm:$0xff]  }
  0x3e   :  { %1800 = vmatpush1.bf16.msra.mxu0 %v2511_v43  ;;  %1637 = vmatprep.subr.bf16.mxu1 %v2512_v44  ;;  %v2587_v43 = vld [vmem:[#allocation2 + $0x570] ss:$8 sps:$4 sm:$0xff]   ;;  %v2592_v44 = vld [vmem:[#allocation2 + $0x184] ss:$8 sps:$4 sm:$0xff]  }
  0x3f   :  { %1801 = vmatprep.subr.bf16.mxu0 %v2514_v45  ;;  %v2595_v45 = vld [vmem:[#allocation2 + $0x584] ss:$8 sps:$4 sm:$0xff]  }
  0x41   :  { %1638 = vmatpush1.bf16.msra.mxu1 %v2516_v47  ;;  %v2593_v47 = vld [vmem:[#allocation2 + $0x580] ss:$8 sps:$4 sm:$0xff]  }
  0x42   :  { %1802 = vmatpush1.bf16.msra.mxu0 %v2517_v49  ;;  %1639 = vmatprep.subr.bf16.mxu1 %v2518_v51  ;;  %v2601_v49 = vld [vmem:[#allocation2 + $0x594] ss:$8 sps:$4 sm:$0xff]   ;;  %v2599_v51 = vld [vmem:[#allocation2 + $0x590] ss:$8 sps:$4 sm:$0xff]  }
  0x43   :  { %1803 = vmatprep.subr.bf16.mxu0 %v2520_v52  ;;  %v2604_v52 = vld [vmem:[#allocation2 + $0x1a4] ss:$8 sps:$4 sm:$0xff]  }
  0x45   :  { %1640 = vmatpush1.bf16.msra.mxu1 %v2522_v54  ;;  %v2602_v54 = vld [vmem:[#allocation2 + $0x1a0] ss:$8 sps:$4 sm:$0xff]  }
  0x46   :  { %1804 = vmatpush1.bf16.msra.mxu0 %v2523_v55  ;;  %1641 = vmatprep.subr.bf16.mxu1 %v2524_v56  ;;  %v2605_v55 = vld [vmem:[#allocation2 + $0x5a0] ss:$8 sps:$4 sm:$0xff]   ;;  %v2610_v56 = vld [vmem:[#allocation2 + $0x1b4] ss:$8 sps:$4 sm:$0xff]  }
  0x47   :  { %1805 = vmatprep.subr.bf16.mxu0 %v2526_v57  ;;  %v2613_v57 = vld [vmem:[#allocation2 + $0x5b4] ss:$8 sps:$4 sm:$0xff]  }
  0x49   :  { %1642 = vmatpush1.bf16.msra.mxu1 %v2528_v58  ;;  %v2608_v58 = vld [vmem:[#allocation2 + $0x1b0] ss:$8 sps:$4 sm:$0xff]  }
  0x4a   :  { %1806 = vmatpush1.bf16.msra.mxu0 %v2529_v59  ;;  %1643 = vmatprep.subr.bf16.mxu1 %v2530_v60  ;;  %v2611_v59 = vld [vmem:[#allocation2 + $0x5b0] ss:$8 sps:$4 sm:$0xff]   ;;  %v2616_v60 = vld [vmem:[#allocation2 + $0x1c4] ss:$8 sps:$4 sm:$0xff]  }
  0x4b   :  { %1807 = vmatprep.subr.bf16.mxu0 %v2532_v61  ;;  %v2619_v61 = vld [vmem:[#allocation2 + $0x5c4] ss:$8 sps:$4 sm:$0xff]  }
  0x4d   :  { %1644 = vmatpush1.bf16.msra.mxu1 %v2534_v62  ;;  %v2614_v62 = vld [vmem:[#allocation2 + $0x1c0] ss:$8 sps:$4 sm:$0xff]  }
  0x4e   :  { %1808 = vmatpush1.bf16.msra.mxu0 %v2535_v63  ;;  %1645 = vmatprep.subr.bf16.mxu1 %v2536_v0  ;;  %v2617_v63 = vld [vmem:[#allocation2 + $0x5c0] ss:$8 sps:$4 sm:$0xff]   ;;  %v2622_v0 = vld [vmem:[#allocation2 + $0x1d4] ss:$8 sps:$4 sm:$0xff]  }
  0x4f   :  { %1809 = vmatprep.subr.bf16.mxu0 %v2538_v1  ;;  %v2625_v1 = vld [vmem:[#allocation2 + $0x5d4] ss:$8 sps:$4 sm:$0xff]  }
  0x51   :  { %1646 = vmatpush1.bf16.msra.mxu1 %v2540_v2  ;;  %v2620_v2 = vld [vmem:[#allocation2 + $0x1d0] ss:$8 sps:$4 sm:$0xff]  }
  0x52   :  { %1810 = vmatpush1.bf16.msra.mxu0 %v2541_v3  ;;  %1656 = vmatprep.subr.bf16.mxu1 %v2544_v4  ;;  %v2623_v3 = vld [vmem:[#allocation2 + $0x5d0] ss:$8 sps:$4 sm:$0xff]   ;;  %v2628_v4 = vld [vmem:[#allocation2 + $0x1e4] ss:$8 sps:$4 sm:$0xff]  }
  0x53   :  { %1820 = vmatprep.subr.bf16.mxu0 %v2547_v7  ;;  %v2629_v7 = vld [vmem:[#allocation2 + $0x5e0] ss:$8 sps:$4 sm:$0xff]  }
  0x54   :  { %1648 = vmatmul.mubr.bf16.vlgmr.msra.gmra.mrb[0].mxu1 %v51_v10  ;;  %v2632_v10 = vld [vmem:[#allocation2 + $0x1f0] ss:$8 sps:$4 sm:$0xff]  }
  0x55   :  { %1812 = vmatmul.mubr.bf16.vlgmr.msra.gmra.mrb[0].mxu0 %v59_v11  ;;  %1657 = vmatpush1.bf16.msra.mxu1 %v2542_v8  ;;  %v2634_v8 = vld [vmem:[#allocation2 + $0x1f4] ss:$8 sps:$4 sm:$0xff]   ;;  %v2635_v11 = vld [vmem:[#allocation2 + $0x5f0] ss:$8 sps:$4 sm:$0xff]  }
  0x56   :  { %1821 = vmatpush1.bf16.msra.mxu0 %v2545_v9  ;;  %1658 = vmatprep.subr.bf16.mxu1 %v2550_v12  ;;  %v2637_v9 = vld [vmem:[#allocation2 + $0x5f4] ss:$8 sps:$4 sm:$0xff]   ;;  %v2640_v12 = vld [vmem:[#allocation2 + $0x204] ss:$8 sps:$4 sm:$0xff]  }
  0x57   :  { %1822 = vmatprep.subr.bf16.mxu0 %v2553_v13  ;;  %1688 = vmatprep.mubr.bf16.mxu1 %v54_v36  ;;  %v37_v13 = vld [vmem:[%s3098_s0 + $0x10] sm:$0xff]  ;;  %v2664_v36 = vld [vmem:[#allocation2 + $0x244] ss:$8 sps:$4 sm:$0xff]  }
  0x58   :  { %1852 = vmatprep.mubr.bf16.mxu0 %v62_v41  ;;  %v2673_v41 = vld [vmem:[#allocation2 + $0x654] ss:$8 sps:$4 sm:$0xff]  }
  0x59   :  { %1659 = vmatpush1.bf16.msra.mxu1 %v2548_v14  ;;  %v45_v14 = vld [vmem:[%s3098_s0 + $0x50] sm:$0xff] }
  0x5a   :  { %1823 = vmatpush1.bf16.msra.mxu0 %v2551_v15  ;;  %1660 = vmatprep.subr.bf16.mxu1 %v2556_v16  ;;  %v2643_v15 = vld [vmem:[#allocation2 + $0x604] ss:$8 sps:$4 sm:$0xff]   ;;  %v2638_v16 = vld [vmem:[#allocation2 + $0x200] ss:$8 sps:$4 sm:$0xff]  }
  0x5b   :  { %1824 = vmatprep.subr.bf16.mxu0 %v2559_v17  ;;  %v2641_v17 = vld [vmem:[#allocation2 + $0x600] ss:$8 sps:$4 sm:$0xff]  }
  0x5d   :  { %1661 = vmatpush1.bf16.msra.mxu1 %v2554_v18  ;;  %v53_v18 = vpack.c.bf16 %v37_v13, %v37_v13  ;;  %v2727_v13 = vld [vmem:[#allocation2 + $0x6e4] ss:$8 sps:$4 sm:$0xff]  }
  0x5e   :  { %1825 = vmatpush1.bf16.msra.mxu0 %v2557_v19  ;;  %1662 = vmatprep.subr.bf16.mxu1 %v2562_v20  ;;  %v61_v19 = vpack.c.bf16 %v45_v14, %v45_v14  ;;  %v2646_v20 = vld [vmem:[#allocation2 + $0x214] ss:$8 sps:$4 sm:$0xff]   ;;  %v2722_v14 = vld [vmem:[#allocation2 + $0x2e0] ss:$8 sps:$4 sm:$0xff]  }
  0x5f   :  { %1826 = vmatprep.subr.bf16.mxu0 %v2565_v21  ;;  %v2649_v21 = vld [vmem:[#allocation2 + $0x614] ss:$8 sps:$4 sm:$0xff]  }
  0x61   :  { %1663 = vmatpush1.bf16.msra.mxu1 %v2560_v22  ;;  %v40_v22 = vld [vmem:[%s3098_s0 + $0x28] sm:$0xff] }
  0x62   :  { %1827 = vmatpush1.bf16.msra.mxu0 %v2563_v23  ;;  %1664 = vmatprep.subr.bf16.mxu1 %v2568_v24  ;;  %v2644_v23 = vld [vmem:[#allocation2 + $0x210] ss:$8 sps:$4 sm:$0xff]   ;;  %v56_v24 = vpack.c.bf16 %v40_v22, %v40_v22  ;;  %v2736_v22 = vld [vmem:[#allocation2 + $0x304] ss:$8 sps:$4 sm:$0xff]  }
  0x63   :  { %1828 = vmatprep.subr.bf16.mxu0 %v2571_v25  ;;  %v2647_v25 = vld [vmem:[#allocation2 + $0x610] ss:$8 sps:$4 sm:$0xff]  }
  0x65   :  { %1665 = vmatpush1.bf16.msra.mxu1 %v2566_v26  ;;  %v48_v26 = vld [vmem:[%s3098_s0 + $0x68] sm:$0xff] }
  0x66   :  { %1829 = vmatpush1.bf16.msra.mxu0 %v2569_v27  ;;  %1666 = vmatprep.subr.bf16.mxu1 %v2574_v28  ;;  %v2652_v27 = vld [vmem:[#allocation2 + $0x224] ss:$8 sps:$4 sm:$0xff]  }
  0x67   :  { %1830 = vmatprep.subr.bf16.mxu0 %v2577_v29  ;;  %v2655_v28 = vld [vmem:[#allocation2 + $0x624] ss:$8 sps:$4 sm:$0xff]   ;;  %v64_v29 = vpack.c.bf16 %v48_v26, %v48_v26  ;;  %v42_v26 = vld [vmem:[%s3098_s0 + $0x38] sm:$0xff] }
  0x69   :  { %1667 = vmatpush1.bf16.msra.mxu1 %v2572_v30  ;;  %v2650_v30 = vld [vmem:[#allocation2 + $0x220] ss:$8 sps:$4 sm:$0xff]  }
  0x6a   :  { %1831 = vmatpush1.bf16.msra.mxu0 %v2575_v31  ;;  %1668 = vmatprep.subr.bf16.mxu1 %v2580_v32  ;;  %v2653_v31 = vld [vmem:[#allocation2 + $0x620] ss:$8 sps:$4 sm:$0xff]   ;;  %v2658_v32 = vld [vmem:[#allocation2 + $0x234] ss:$8 sps:$4 sm:$0xff]  }
  0x6b   :  { %1832 = vmatprep.subr.bf16.mxu0 %v2583_v33  ;;  %v2661_v33 = vld [vmem:[#allocation2 + $0x634] ss:$8 sps:$4 sm:$0xff]  }
  0x6d   :  { %1669 = vmatpush1.bf16.msra.mxu1 %v2578_v35  ;;  %v2659_v35 = vld [vmem:[#allocation2 + $0x630] ss:$8 sps:$4 sm:$0xff]  }
  0x6e   :  { %1833 = vmatpush1.bf16.msra.mxu0 %v2581_v37  ;;  %1670 = vmatprep.subr.bf16.mxu1 %v2586_v39  ;;  %v2667_v37 = vld [vmem:[#allocation2 + $0x644] ss:$8 sps:$4 sm:$0xff]   ;;  %v2665_v39 = vld [vmem:[#allocation2 + $0x640] ss:$8 sps:$4 sm:$0xff]  }
  0x6f   :  { %1834 = vmatprep.subr.bf16.mxu0 %v2589_v40  ;;  %v2670_v40 = vld [vmem:[#allocation2 + $0x254] ss:$8 sps:$4 sm:$0xff]  }
  0x71   :  { %1671 = vmatpush1.bf16.msra.mxu1 %v2584_v42  ;;  %v2668_v42 = vld [vmem:[#allocation2 + $0x250] ss:$8 sps:$4 sm:$0xff]  }
  0x72   :  { %1835 = vmatpush1.bf16.msra.mxu0 %v2587_v43  ;;  %1672 = vmatprep.subr.bf16.mxu1 %v2592_v44  ;;  %v2671_v43 = vld [vmem:[#allocation2 + $0x650] ss:$8 sps:$4 sm:$0xff]   ;;  %v2676_v44 = vld [vmem:[#allocation2 + $0x264] ss:$8 sps:$4 sm:$0xff]  }
  0x73   :  { %1836 = vmatprep.subr.bf16.mxu0 %v2595_v45  ;;  %v2679_v45 = vld [vmem:[#allocation2 + $0x664] ss:$8 sps:$4 sm:$0xff]  }
  0x75   :  { %1673 = vmatpush1.bf16.msra.mxu1 %v2590_v46  ;;  %v2674_v46 = vld [vmem:[#allocation2 + $0x260] ss:$8 sps:$4 sm:$0xff]  }
  0x76   :  { %1837 = vmatpush1.bf16.msra.mxu0 %v2593_v47  ;;  %1674 = vmatprep.subr.bf16.mxu1 %v2598_v48  ;;  %v2677_v47 = vld [vmem:[#allocation2 + $0x660] ss:$8 sps:$4 sm:$0xff]   ;;  %v2682_v48 = vld [vmem:[#allocation2 + $0x274] ss:$8 sps:$4 sm:$0xff]  }
  0x77   :  { %1838 = vmatprep.subr.bf16.mxu0 %v2601_v49  ;;  %v2685_v49 = vld [vmem:[#allocation2 + $0x674] ss:$8 sps:$4 sm:$0xff]  }
  0x79   :  { %1675 = vmatpush1.bf16.msra.mxu1 %v2596_v50  ;;  %v2680_v50 = vld [vmem:[#allocation2 + $0x270] ss:$8 sps:$4 sm:$0xff]  }
  0x7a   :  { %1839 = vmatpush1.bf16.msra.mxu0 %v2599_v51  ;;  %1676 = vmatprep.subr.bf16.mxu1 %v2604_v52  ;;  %v2683_v51 = vld [vmem:[#allocation2 + $0x670] ss:$8 sps:$4 sm:$0xff]   ;;  %v2688_v52 = vld [vmem:[#allocation2 + $0x284] ss:$8 sps:$4 sm:$0xff]  }
  0x7b   :  { %1840 = vmatprep.subr.bf16.mxu0 %v2607_v53  ;;  %v2691_v53 = vld [vmem:[#allocation2 + $0x684] ss:$8 sps:$4 sm:$0xff]  }
  0x7d   :  { %1677 = vmatpush1.bf16.msra.mxu1 %v2602_v54  ;;  %v2686_v54 = vld [vmem:[#allocation2 + $0x280] ss:$8 sps:$4 sm:$0xff]  }
  0x7e   :  { %1841 = vmatpush1.bf16.msra.mxu0 %v2605_v55  ;;  %1678 = vmatprep.subr.bf16.mxu1 %v2610_v56  ;;  %v2689_v55 = vld [vmem:[#allocation2 + $0x680] ss:$8 sps:$4 sm:$0xff]   ;;  %v2694_v56 = vld [vmem:[#allocation2 + $0x294] ss:$8 sps:$4 sm:$0xff]  }
  0x7f   :  { %1842 = vmatprep.subr.bf16.mxu0 %v2613_v57  ;;  %v2697_v57 = vld [vmem:[#allocation2 + $0x694] ss:$8 sps:$4 sm:$0xff]  }
  0x81   :  { %1679 = vmatpush1.bf16.msra.mxu1 %v2608_v58  ;;  %v2692_v58 = vld [vmem:[#allocation2 + $0x290] ss:$8 sps:$4 sm:$0xff]  }
  0x82   :  { %1843 = vmatpush1.bf16.msra.mxu0 %v2611_v59  ;;  %1680 = vmatprep.subr.bf16.mxu1 %v2616_v60  ;;  %v2695_v59 = vld [vmem:[#allocation2 + $0x690] ss:$8 sps:$4 sm:$0xff]   ;;  %v2700_v60 = vld [vmem:[#allocation2 + $0x2a4] ss:$8 sps:$4 sm:$0xff]  }
  0x83   :  { %1844 = vmatprep.subr.bf16.mxu0 %v2619_v61  ;;  %v2703_v61 = vld [vmem:[#allocation2 + $0x6a4] ss:$8 sps:$4 sm:$0xff]  }
  0x85   :  { %1681 = vmatpush1.bf16.msra.mxu1 %v2614_v62  ;;  %v2698_v62 = vld [vmem:[#allocation2 + $0x2a0] ss:$8 sps:$4 sm:$0xff]  }
  0x86   :  { %1845 = vmatpush1.bf16.msra.mxu0 %v2617_v63  ;;  %1682 = vmatprep.subr.bf16.mxu1 %v2622_v0  ;;  %v2701_v63 = vld [vmem:[#allocation2 + $0x6a0] ss:$8 sps:$4 sm:$0xff]   ;;  %v2706_v0 = vld [vmem:[#allocation2 + $0x2b4] ss:$8 sps:$4 sm:$0xff]  }
  0x87   :  { %1846 = vmatprep.subr.bf16.mxu0 %v2625_v1  ;;  %v2709_v1 = vld [vmem:[#allocation2 + $0x6b4] ss:$8 sps:$4 sm:$0xff]  }
  0x89   :  { %1683 = vmatpush1.bf16.msra.mxu1 %v2620_v2  ;;  %v2704_v2 = vld [vmem:[#allocation2 + $0x2b0] ss:$8 sps:$4 sm:$0xff]  }
  0x8a   :  { %1847 = vmatpush1.bf16.msra.mxu0 %v2623_v3  ;;  %1684 = vmatprep.subr.bf16.mxu1 %v2628_v4  ;;  %v2707_v3 = vld [vmem:[#allocation2 + $0x6b0] ss:$8 sps:$4 sm:$0xff]   ;;  %v2712_v4 = vld [vmem:[#allocation2 + $0x2c4] ss:$8 sps:$4 sm:$0xff]  }
  0x8b   :  { %1848 = vmatprep.subr.bf16.mxu0 %v2631_v5  ;;  %v2715_v5 = vld [vmem:[#allocation2 + $0x6c4] ss:$8 sps:$4 sm:$0xff]  }
  0x8d   :  { %1685 = vmatpush1.bf16.msra.mxu1 %v2626_v6  ;;  %v2710_v6 = vld [vmem:[#allocation2 + $0x2c0] ss:$8 sps:$4 sm:$0xff]  }
  0x8e   :  { %1849 = vmatpush1.bf16.msra.mxu0 %v2629_v7  ;;  %1686 = vmatprep.subr.bf16.mxu1 %v2634_v8  ;;  %v2713_v7 = vld [vmem:[#allocation2 + $0x6c0] ss:$8 sps:$4 sm:$0xff]   ;;  %v2718_v8 = vld [vmem:[#allocation2 + $0x2d4] ss:$8 sps:$4 sm:$0xff]  }
  0x8f   :  { %1850 = vmatprep.subr.bf16.mxu0 %v2637_v9  ;;  %v2721_v9 = vld [vmem:[#allocation2 + $0x6d4] ss:$8 sps:$4 sm:$0xff]  }
  0x91   :  { %1687 = vmatpush1.bf16.msra.mxu1 %v2632_v10  ;;  %v2716_v10 = vld [vmem:[#allocation2 + $0x2d0] ss:$8 sps:$4 sm:$0xff]  }
  0x92   :  { %1851 = vmatpush1.bf16.msra.mxu0 %v2635_v11  ;;  %1697 = vmatprep.subr.bf16.mxu1 %v2640_v12  ;;  %v2719_v11 = vld [vmem:[#allocation2 + $0x6d0] ss:$8 sps:$4 sm:$0xff]   ;;  %v2724_v12 = vld [vmem:[#allocation2 + $0x2e4] ss:$8 sps:$4 sm:$0xff]  }
  0x93   :  { %1861 = vmatprep.subr.bf16.mxu0 %v2643_v15  ;;  %v2725_v15 = vld [vmem:[#allocation2 + $0x6e0] ss:$8 sps:$4 sm:$0xff]  }
  0x94   :  { %1689 = vmatmul.mubr.bf16.vlgmr.msra.gmra.mrb[0].mxu1 %v53_v18  ;;  %v2728_v18 = vld [vmem:[#allocation2 + $0x2f0] ss:$8 sps:$4 sm:$0xff]  }
  0x95   :  { %1853 = vmatmul.mubr.bf16.vlgmr.msra.gmra.mrb[0].mxu0 %v61_v19  ;;  %1698 = vmatpush1.bf16.msra.mxu1 %v2638_v16  ;;  %v2730_v16 = vld [vmem:[#allocation2 + $0x2f4] ss:$8 sps:$4 sm:$0xff]   ;;  %v2731_v19 = vld [vmem:[#allocation2 + $0x6f0] ss:$8 sps:$4 sm:$0xff]  }
  0x96   :  { %1862 = vmatpush1.bf16.msra.mxu0 %v2641_v17  ;;  %1699 = vmatprep.subr.bf16.mxu1 %v2646_v20  ;;  %v2733_v17 = vld [vmem:[#allocation2 + $0x6f4] ss:$8 sps:$4 sm:$0xff]   ;;  %v39_v20 = vld [vmem:[%s3098_s0 + $0x20] sm:$0xff] }
  0x97   :  { %1863 = vmatprep.subr.bf16.mxu0 %v2649_v21  ;;  %1729 = vmatprep.mubr.bf16.mxu1 %v56_v24  ;;  %v47_v21 = vld [vmem:[%s3098_s0 + $0x60] sm:$0xff]  ;;  %v55_v24 = vpack.c.bf16 %v39_v20, %v39_v20 }
  0x98   :  { %1893 = vmatprep.mubr.bf16.mxu0 %v64_v29  ;;  %v2737_v29 = vld [vmem:[#allocation2 + $0x700] ss:$8 sps:$4 sm:$0xff]   ;;  %v2820_v20 = vld [vmem:[#allocation2 + $0x3e4] ss:$8 sps:$4 sm:$0xff]  }
  0x99   :  { %1700 = vmatpush1.bf16.msra.mxu1 %v2644_v23  ;;  %v2739_v23 = vld [vmem:[#allocation2 + $0x704] ss:$8 sps:$4 sm:$0xff]  }
  0x9a   :  { %1864 = vmatpush1.bf16.msra.mxu0 %v2647_v25  ;;  %1701 = vmatprep.subr.bf16.mxu1 %v2652_v27  ;;  %v63_v25 = vpack.c.bf16 %v47_v21, %v47_v21  ;;  %v50_v27 = vld [vmem:[%s3098_s0 + $0x78] sm:$0xff]  ;;  %v2823_v21 = vld [vmem:[#allocation2 + $0x7e4] ss:$8 sps:$4 sm:$0xff]  }
  0x9b   :  { %1865 = vmatprep.subr.bf16.mxu0 %v2655_v28  ;;  %v2734_v28 = vld [vmem:[#allocation2 + $0x300] ss:$8 sps:$4 sm:$0xff]  }
  0x9d   :  { %1702 = vmatpush1.bf16.msra.mxu1 %v2650_v30  ;;  %v2742_v30 = vld [vmem:[#allocation2 + $0x314] ss:$8 sps:$4 sm:$0xff]  }
  0x9e   :  { %1866 = vmatpush1.bf16.msra.mxu0 %v2653_v31  ;;  %1703 = vmatprep.subr.bf16.mxu1 %v2658_v32  ;;  %v2745_v31 = vld [vmem:[#allocation2 + $0x714] ss:$8 sps:$4 sm:$0xff]   ;;  %v58_v32 = vpack.c.bf16 %v42_v26, %v42_v26  ;;  %v2824_v26 = vld [vmem:[#allocation2 + $0x3f0] ss:$8 sps:$4 sm:$0xff]  }
  0x9f   :  { %1867 = vmatprep.subr.bf16.mxu0 %v2661_v33  ;;  %v66_v33 = vpack.c.bf16 %v50_v27, %v50_v27  ;;  %v2827_v27 = vld [vmem:[#allocation2 + $0x7f0] ss:$8 sps:$4 sm:$0xff]  }
  0xa1   :  { %1704 = vmatpush1.bf16.msra.mxu1 %v2656_v34  ;;  %v2740_v34 = vld [vmem:[#allocation2 + $0x310] ss:$8 sps:$4 sm:$0xff]  }
  0xa2   :  { %1868 = vmatpush1.bf16.msra.mxu0 %v2659_v35  ;;  %1705 = vmatprep.subr.bf16.mxu1 %v2664_v36  ;;  %v2743_v35 = vld [vmem:[#allocation2 + $0x710] ss:$8 sps:$4 sm:$0xff]   ;;  %v2748_v36 = vld [vmem:[#allocation2 + $0x324] ss:$8 sps:$4 sm:$0xff]  }
  0xa3   :  { %1869 = vmatprep.subr.bf16.mxu0 %v2667_v37  ;;  %v2751_v37 = vld [vmem:[#allocation2 + $0x724] ss:$8 sps:$4 sm:$0xff]  }
  0xa5   :  { %1706 = vmatpush1.bf16.msra.mxu1 %v2662_v38  ;;  %v2746_v38 = vld [vmem:[#allocation2 + $0x320] ss:$8 sps:$4 sm:$0xff]  }
  0xa6   :  { %1870 = vmatpush1.bf16.msra.mxu0 %v2665_v39  ;;  %1707 = vmatprep.subr.bf16.mxu1 %v2670_v40  ;;  %v2749_v39 = vld [vmem:[#allocation2 + $0x720] ss:$8 sps:$4 sm:$0xff]   ;;  %v2754_v40 = vld [vmem:[#allocation2 + $0x334] ss:$8 sps:$4 sm:$0xff]  }
  0xa7   :  { %1871 = vmatprep.subr.bf16.mxu0 %v2673_v41  ;;  %v2757_v41 = vld [vmem:[#allocation2 + $0x734] ss:$8 sps:$4 sm:$0xff]  }
  0xa9   :  { %1708 = vmatpush1.bf16.msra.mxu1 %v2668_v42  ;;  %v2752_v42 = vld [vmem:[#allocation2 + $0x330] ss:$8 sps:$4 sm:$0xff]  }
  0xaa   :  { %1872 = vmatpush1.bf16.msra.mxu0 %v2671_v43  ;;  %1709 = vmatprep.subr.bf16.mxu1 %v2676_v44  ;;  %v2755_v43 = vld [vmem:[#allocation2 + $0x730] ss:$8 sps:$4 sm:$0xff]   ;;  %v2760_v44 = vld [vmem:[#allocation2 + $0x344] ss:$8 sps:$4 sm:$0xff]  }
  0xab   :  { %1873 = vmatprep.subr.bf16.mxu0 %v2679_v45  ;;  %v2763_v45 = vld [vmem:[#allocation2 + $0x744] ss:$8 sps:$4 sm:$0xff]  }
  0xad   :  { %1710 = vmatpush1.bf16.msra.mxu1 %v2674_v46  ;;  %v2758_v46 = vld [vmem:[#allocation2 + $0x340] ss:$8 sps:$4 sm:$0xff]  }
  0xae   :  { %1874 = vmatpush1.bf16.msra.mxu0 %v2677_v47  ;;  %1711 = vmatprep.subr.bf16.mxu1 %v2682_v48  ;;  %v2761_v47 = vld [vmem:[#allocation2 + $0x740] ss:$8 sps:$4 sm:$0xff]   ;;  %v2766_v48 = vld [vmem:[#allocation2 + $0x354] ss:$8 sps:$4 sm:$0xff]  }
  0xaf   :  { %1875 = vmatprep.subr.bf16.mxu0 %v2685_v49  ;;  %v2769_v49 = vld [vmem:[#allocation2 + $0x754] ss:$8 sps:$4 sm:$0xff]  }
  0xb1   :  { %1712 = vmatpush1.bf16.msra.mxu1 %v2680_v50  ;;  %v2764_v50 = vld [vmem:[#allocation2 + $0x350] ss:$8 sps:$4 sm:$0xff]  }
  0xb2   :  { %1876 = vmatpush1.bf16.msra.mxu0 %v2683_v51  ;;  %1713 = vmatprep.subr.bf16.mxu1 %v2688_v52  ;;  %v2767_v51 = vld [vmem:[#allocation2 + $0x750] ss:$8 sps:$4 sm:$0xff]   ;;  %v2772_v52 = vld [vmem:[#allocation2 + $0x364] ss:$8 sps:$4 sm:$0xff]  }
  0xb3   :  { %1877 = vmatprep.subr.bf16.mxu0 %v2691_v53  ;;  %v2775_v53 = vld [vmem:[#allocation2 + $0x764] ss:$8 sps:$4 sm:$0xff]  }
  0xb5   :  { %1714 = vmatpush1.bf16.msra.mxu1 %v2686_v54  ;;  %v2770_v54 = vld [vmem:[#allocation2 + $0x360] ss:$8 sps:$4 sm:$0xff]  }
  0xb6   :  { %1878 = vmatpush1.bf16.msra.mxu0 %v2689_v55  ;;  %1715 = vmatprep.subr.bf16.mxu1 %v2694_v56  ;;  %v2773_v55 = vld [vmem:[#allocation2 + $0x760] ss:$8 sps:$4 sm:$0xff]   ;;  %v2778_v56 = vld [vmem:[#allocation2 + $0x374] ss:$8 sps:$4 sm:$0xff]  }
  0xb7   :  { %1879 = vmatprep.subr.bf16.mxu0 %v2697_v57  ;;  %v2781_v57 = vld [vmem:[#allocation2 + $0x774] ss:$8 sps:$4 sm:$0xff]  }
  0xb9   :  { %1716 = vmatpush1.bf16.msra.mxu1 %v2692_v58  ;;  %v2776_v58 = vld [vmem:[#allocation2 + $0x370] ss:$8 sps:$4 sm:$0xff]  }
  0xba   :  { %1880 = vmatpush1.bf16.msra.mxu0 %v2695_v59  ;;  %1717 = vmatprep.subr.bf16.mxu1 %v2700_v60  ;;  %v2779_v59 = vld [vmem:[#allocation2 + $0x770] ss:$8 sps:$4 sm:$0xff]   ;;  %v2784_v60 = vld [vmem:[#allocation2 + $0x384] ss:$8 sps:$4 sm:$0xff]  }
  0xbb   :  { %1881 = vmatprep.subr.bf16.mxu0 %v2703_v61  ;;  %v2787_v61 = vld [vmem:[#allocation2 + $0x784] ss:$8 sps:$4 sm:$0xff]  }
  0xbd   :  { %1718 = vmatpush1.bf16.msra.mxu1 %v2698_v62  ;;  %v2782_v62 = vld [vmem:[#allocation2 + $0x380] ss:$8 sps:$4 sm:$0xff]  }
  0xbe   :  { %1882 = vmatpush1.bf16.msra.mxu0 %v2701_v63  ;;  %1719 = vmatprep.subr.bf16.mxu1 %v2706_v0  ;;  %v2785_v63 = vld [vmem:[#allocation2 + $0x780] ss:$8 sps:$4 sm:$0xff]   ;;  %v2790_v0 = vld [vmem:[#allocation2 + $0x394] ss:$8 sps:$4 sm:$0xff]  }
  0xbf   :  { %1883 = vmatprep.subr.bf16.mxu0 %v2709_v1  ;;  %v2793_v1 = vld [vmem:[#allocation2 + $0x794] ss:$8 sps:$4 sm:$0xff]  }
  0xc1   :  { %1720 = vmatpush1.bf16.msra.mxu1 %v2704_v2  ;;  %v2788_v2 = vld [vmem:[#allocation2 + $0x390] ss:$8 sps:$4 sm:$0xff]  }
  0xc2   :  { %1884 = vmatpush1.bf16.msra.mxu0 %v2707_v3  ;;  %1721 = vmatprep.subr.bf16.mxu1 %v2712_v4  ;;  %v2791_v3 = vld [vmem:[#allocation2 + $0x790] ss:$8 sps:$4 sm:$0xff]   ;;  %v2796_v4 = vld [vmem:[#allocation2 + $0x3a4] ss:$8 sps:$4 sm:$0xff]  }
  0xc3   :  { %1885 = vmatprep.subr.bf16.mxu0 %v2715_v5  ;;  %v2799_v5 = vld [vmem:[#allocation2 + $0x7a4] ss:$8 sps:$4 sm:$0xff]  }
  0xc5   :  { %1722 = vmatpush1.bf16.msra.mxu1 %v2710_v6  ;;  %v2794_v6 = vld [vmem:[#allocation2 + $0x3a0] ss:$8 sps:$4 sm:$0xff]  }
  0xc6   :  { %1886 = vmatpush1.bf16.msra.mxu0 %v2713_v7  ;;  %1723 = vmatprep.subr.bf16.mxu1 %v2718_v8  ;;  %v2797_v7 = vld [vmem:[#allocation2 + $0x7a0] ss:$8 sps:$4 sm:$0xff]   ;;  %v2802_v8 = vld [vmem:[#allocation2 + $0x3b4] ss:$8 sps:$4 sm:$0xff]  }
  0xc7   :  { %1887 = vmatprep.subr.bf16.mxu0 %v2721_v9  ;;  %v2805_v9 = vld [vmem:[#allocation2 + $0x7b4] ss:$8 sps:$4 sm:$0xff]  }
  0xc9   :  { %1724 = vmatpush1.bf16.msra.mxu1 %v2716_v10  ;;  %v2800_v10 = vld [vmem:[#allocation2 + $0x3b0] ss:$8 sps:$4 sm:$0xff]  }
  0xca   :  { %1888 = vmatpush1.bf16.msra.mxu0 %v2719_v11  ;;  %1725 = vmatprep.subr.bf16.mxu1 %v2724_v12  ;;  %v2803_v11 = vld [vmem:[#allocation2 + $0x7b0] ss:$8 sps:$4 sm:$0xff]   ;;  %v2808_v12 = vld [vmem:[#allocation2 + $0x3c4] ss:$8 sps:$4 sm:$0xff]  }
  0xcb   :  { %1889 = vmatprep.subr.bf16.mxu0 %v2727_v13  ;;  %v2811_v13 = vld [vmem:[#allocation2 + $0x7c4] ss:$8 sps:$4 sm:$0xff]  }
  0xcd   :  { %1726 = vmatpush1.bf16.msra.mxu1 %v2722_v14  ;;  %v2806_v14 = vld [vmem:[#allocation2 + $0x3c0] ss:$8 sps:$4 sm:$0xff]  }
  0xce   :  { %1890 = vmatpush1.bf16.msra.mxu0 %v2725_v15  ;;  %1727 = vmatprep.subr.bf16.mxu1 %v2730_v16  ;;  %v2809_v15 = vld [vmem:[#allocation2 + $0x7c0] ss:$8 sps:$4 sm:$0xff]   ;;  %v2814_v16 = vld [vmem:[#allocation2 + $0x3d4] ss:$8 sps:$4 sm:$0xff]  }
  0xcf   :  { %1891 = vmatprep.subr.bf16.mxu0 %v2733_v17  ;;  %v2817_v17 = vld [vmem:[#allocation2 + $0x7d4] ss:$8 sps:$4 sm:$0xff]  }
  0xd1   :  { %1728 = vmatpush1.bf16.msra.mxu1 %v2728_v18  ;;  %v2812_v18 = vld [vmem:[#allocation2 + $0x3d0] ss:$8 sps:$4 sm:$0xff]  }
  0xd2   :  { %1892 = vmatpush1.bf16.msra.mxu0 %v2731_v19  ;;  %1738 = vmatprep.subr.bf16.mxu1 %v2736_v22  ;;  %v2815_v19 = vld [vmem:[#allocation2 + $0x7d0] ss:$8 sps:$4 sm:$0xff]   ;;  %v2818_v22 = vld [vmem:[#allocation2 + $0x3e0] ss:$8 sps:$4 sm:$0xff]  }
  0xd3   :  { %1902 = vmatprep.subr.bf16.mxu0 %v2739_v23  ;;  %v2821_v23 = vld [vmem:[#allocation2 + $0x7e0] ss:$8 sps:$4 sm:$0xff]  }
  0xd4   :  { %1730 = vmatmul.mubr.bf16.vlgmr.msra.gmra.mrb[0].mxu1 %v55_v24  ;;  %v2826_v24 = vld [vmem:[#allocation2 + $0x3f4] ss:$8 sps:$4 sm:$0xff]  }
  0xd5   :  { %1894 = vmatmul.mubr.bf16.vlgmr.msra.gmra.mrb[0].mxu0 %v63_v25  ;;  %1739 = vmatpush1.bf16.msra.mxu1 %v2734_v28  ;;  %v2829_v25 = vld [vmem:[#allocation2 + $0x7f4] ss:$8 sps:$4 sm:$0xff]  }
  0xd6   :  { %1903 = vmatpush1.bf16.msra.mxu0 %v2737_v29  ;;  %1740 = vmatprep.subr.bf16.mxu1 %v2742_v30  ;;  %v41_v28 = vld [vmem:[%s3098_s0 + $0x30] sm:$0xff] }
  0xd7   :  { %1904 = vmatprep.subr.bf16.mxu0 %v2745_v31  ;;  %1770 = vmatprep.mubr.bf16.mxu1 %v58_v32  ;;  %v49_v29 = vld [vmem:[%s3098_s0 + $0x70] sm:$0xff]  ;;  %v57_v30 = vpack.c.bf16 %v41_v28, %v41_v28  ;;  %v1971_v32 = vld [vmem:[%s3101_s3 + $0x80] sm:$0xff] }
  0xd8   :  { %1934 = vmatprep.mubr.bf16.mxu0 %v66_v33  ;;  %v65_v31 = vpack.c.bf16 %v49_v29, %v49_v29  ;;  %v1972_v33 = vld [vmem:[%s3101_s3 + $0x88] sm:$0xff] }
  0xd9   :  { %1741 = vmatpush1.bf16.msra.mxu1 %v2740_v34  ;;  %v2382_v34 = vpack.c.bf16 %v1972_v33, %v1971_v32 }
  0xda   :  { %1905 = vmatpush1.bf16.msra.mxu0 %v2743_v35  ;;  %1742 = vmatprep.subr.bf16.mxu1 %v2748_v36  ;;  %v1955_v35 = vld [vmem:[%s3101_s3] sm:$0xff]  ;;  %v1956_v36 = vld [vmem:[%s3101_s3 + $0x8] sm:$0xff] }
  0xdb   :  { %1906 = vmatprep.subr.bf16.mxu0 %v2751_v37  ;;  %v2384_v37 = vpack.c.bf16 %v1956_v36, %v1955_v35 }
  0xdd   :  { %1743 = vmatpush1.bf16.msra.mxu1 %v2746_v38  ;;  %v1973_v38 = vld [vmem:[%s3101_s3 + $0x90] sm:$0xff] }
  0xde   :  { %1907 = vmatpush1.bf16.msra.mxu0 %v2749_v39  ;;  %1744 = vmatprep.subr.bf16.mxu1 %v2754_v40  ;;  %v1974_v39 = vld [vmem:[%s3101_s3 + $0x98] sm:$0xff] }
  0xdf   :  { %1908 = vmatprep.subr.bf16.mxu0 %v2757_v41  ;;  %v2386_v40 = vpack.c.bf16 %v1974_v39, %v1973_v38  ;;  %v1957_v41 = vld [vmem:[%s3101_s3 + $0x10] sm:$0xff] }
  0xe1   :  { %1745 = vmatpush1.bf16.msra.mxu1 %v2752_v42  ;;  %v1958_v42 = vld [vmem:[%s3101_s3 + $0x18] sm:$0xff] }
  0xe2   :  { %1909 = vmatpush1.bf16.msra.mxu0 %v2755_v43  ;;  %1746 = vmatprep.subr.bf16.mxu1 %v2760_v44  ;;  %v2388_v43 = vpack.c.bf16 %v1958_v42, %v1957_v41  ;;  %v1975_v44 = vld [vmem:[%s3101_s3 + $0xa0] sm:$0xff] }
  0xe3   :  { %1910 = vmatprep.subr.bf16.mxu0 %v2763_v45  ;;  %v1976_v45 = vld [vmem:[%s3101_s3 + $0xa8] sm:$0xff] }
  0xe5   :  { %1747 = vmatpush1.bf16.msra.mxu1 %v2758_v46  ;;  %v2390_v46 = vpack.c.bf16 %v1976_v45, %v1975_v44  ;;  %v2345_v44 = vld [vmem:[%s3102_s4] ss:$0 sm:$0xff] }
  0xe6   :  { %1911 = vmatpush1.bf16.msra.mxu0 %v2761_v47  ;;  %1748 = vmatprep.subr.bf16.mxu1 %v2766_v48  ;;  %v1959_v47 = vld [vmem:[%s3101_s3 + $0x20] sm:$0xff]  ;;  %v1960_v48 = vld [vmem:[%s3101_s3 + $0x28] sm:$0xff] }
  0xe7   :  { %1912 = vmatprep.subr.bf16.mxu0 %v2769_v49  ;;  %v2392_v49 = vpack.c.bf16 %v1960_v48, %v1959_v47 }
  0xe9   :  { %1749 = vmatpush1.bf16.msra.mxu1 %v2764_v50  ;;  %v1977_v50 = vld [vmem:[%s3101_s3 + $0xb0] sm:$0xff] }
  0xea   :  { %1913 = vmatpush1.bf16.msra.mxu0 %v2767_v51  ;;  %1750 = vmatprep.subr.bf16.mxu1 %v2772_v52  ;;  %v1978_v51 = vld [vmem:[%s3101_s3 + $0xb8] sm:$0xff] }
  0xeb   :  { %1914 = vmatprep.subr.bf16.mxu0 %v2775_v53  ;;  %v2394_v52 = vpack.c.bf16 %v1978_v51, %v1977_v50  ;;  %v1961_v53 = vld [vmem:[%s3101_s3 + $0x30] sm:$0xff] }
  0xed   :  { %1751 = vmatpush1.bf16.msra.mxu1 %v2770_v54  ;;  %v1962_v54 = vld [vmem:[%s3101_s3 + $0x38] sm:$0xff] }
  0xee   :  { %1915 = vmatpush1.bf16.msra.mxu0 %v2773_v55  ;;  %1752 = vmatprep.subr.bf16.mxu1 %v2778_v56  ;;  %v2396_v55 = vpack.c.bf16 %v1962_v54, %v1961_v53  ;;  %v1979_v56 = vld [vmem:[%s3101_s3 + $0xc0] sm:$0xff] }
  0xef   :  { %1916 = vmatprep.subr.bf16.mxu0 %v2781_v57  ;;  %v1980_v57 = vld [vmem:[%s3101_s3 + $0xc8] sm:$0xff] }
  0xf1   :  { %1753 = vmatpush1.bf16.msra.mxu1 %v2776_v58  ;;  %v2398_v58 = vpack.c.bf16 %v1980_v57, %v1979_v56 }
  0xf2   :  { %1917 = vmatpush1.bf16.msra.mxu0 %v2779_v59  ;;  %1754 = vmatprep.subr.bf16.mxu1 %v2784_v60  ;;  %v1963_v59 = vld [vmem:[%s3101_s3 + $0x40] sm:$0xff]  ;;  %v1964_v60 = vld [vmem:[%s3101_s3 + $0x48] sm:$0xff] }
  0xf3   :  { %1918 = vmatprep.subr.bf16.mxu0 %v2787_v61  ;;  %v2400_v61 = vpack.c.bf16 %v1964_v60, %v1963_v59 }
  0xf5   :  { %1755 = vmatpush1.bf16.msra.mxu1 %v2782_v62  ;;  %v1981_v62 = vld [vmem:[%s3101_s3 + $0xd0] sm:$0xff] }
  0xf6   :  { %1919 = vmatpush1.bf16.msra.mxu0 %v2785_v63  ;;  %1756 = vmatprep.subr.bf16.mxu1 %v2790_v0  ;;  %v1982_v63 = vld [vmem:[%s3101_s3 + $0xd8] sm:$0xff] }
  0xf7   :  { %1920 = vmatprep.subr.bf16.mxu0 %v2793_v1  ;;  %v2402_v0 = vpack.c.bf16 %v1982_v63, %v1981_v62  ;;  %v1965_v1 = vld [vmem:[%s3101_s3 + $0x50] sm:$0xff] }
  0xf9   :  { %1757 = vmatpush1.bf16.msra.mxu1 %v2788_v2  ;;  %v1966_v2 = vld [vmem:[%s3101_s3 + $0x58] sm:$0xff] }
  0xfa   :  { %1921 = vmatpush1.bf16.msra.mxu0 %v2791_v3  ;;  %1758 = vmatprep.subr.bf16.mxu1 %v2796_v4  ;;  %v2404_v3 = vpack.c.bf16 %v1966_v2, %v1965_v1  ;;  %v1983_v4 = vld [vmem:[%s3101_s3 + $0xe0] sm:$0xff] }
  0xfb   :  { %1922 = vmatprep.subr.bf16.mxu0 %v2799_v5  ;;  %v1984_v5 = vld [vmem:[%s3101_s3 + $0xe8] sm:$0xff] }
  0xfd   :  { %1759 = vmatpush1.bf16.msra.mxu1 %v2794_v6  ;;  %v1967_v6 = vld [vmem:[%s3101_s3 + $0x60] sm:$0xff] }
  0xfe   :  { %1923 = vmatpush1.bf16.msra.mxu0 %v2797_v7  ;;  %1760 = vmatprep.subr.bf16.mxu1 %v2802_v8  ;;  %v2406_v7 = vpack.c.bf16 %v1984_v5, %v1983_v4  ;;  %v1968_v8 = vld [vmem:[%s3101_s3 + $0x68] sm:$0xff] }
  0xff   :  { %1924 = vmatprep.subr.bf16.mxu0 %v2805_v9  ;;  %v1985_v9 = vld [vmem:[%s3101_s3 + $0xf0] sm:$0xff] }
 0x101   :  { %1761 = vmatpush1.bf16.msra.mxu1 %v2800_v10  ;;  %v1986_v10 = vld [vmem:[%s3101_s3 + $0xf8] sm:$0xff] }
 0x102   :  { %1925 = vmatpush1.bf16.msra.mxu0 %v2803_v11  ;;  %1762 = vmatprep.subr.bf16.mxu1 %v2808_v12  ;;  %v2408_v11 = vpack.c.bf16 %v1968_v8, %v1967_v6  ;;  %v2410_v12 = vpack.c.bf16 %v1986_v10, %v1985_v9 }
 0x103   :  { %1926 = vmatprep.subr.bf16.mxu0 %v2811_v13  ;;  %v1969_v13 = vld [vmem:[%s3101_s3 + $0x70] sm:$0xff] }
 0x105   :  { %1763 = vmatpush1.bf16.msra.mxu1 %v2806_v14  ;;  %v1970_v14 = vld [vmem:[%s3101_s3 + $0x78] sm:$0xff] }
 0x106   :  { %1927 = vmatpush1.bf16.msra.mxu0 %v2809_v15  ;;  %1764 = vmatprep.subr.bf16.mxu1 %v2814_v16  ;;  %v2412_v15 = vpack.c.bf16 %v1970_v14, %v1969_v13  ;;  %v325_v16 = vlaneseq }
 0x107   :  { %1928 = vmatprep.subr.bf16.mxu0 %v2817_v17 }
 0x108   :  { %v326_v17 = vshrl.u32 %v325_v16, 7 }
 0x109   :  { %1765 = vmatpush1.bf16.msra.mxu1 %v2812_v18 }
 0x10a   :  { %1929 = vmatpush1.bf16.msra.mxu0 %v2815_v19  ;;  %1766 = vmatprep.subr.bf16.mxu1 %v2820_v20  ;;  %v327_v18 = vsub.s32 0, %v326_v17  ;;  %v323_v19 = vld [vmem:[%s3100_s2] sm:$0x3]  ;;  %v331_v20 = vsub.s32 1, %v326_v17 }
 0x10b   :  { %1930 = vmatprep.subr.bf16.mxu0 %v2823_v21 }
 0x10c   :  { %v328_v21 = vrot.slane %v323_v19, %v327_v18 }
 0x10d   :  { %1767 = vmatpush1.bf16.msra.mxu1 %v2818_v22  ;;  %v332_v22 = vrot.slane %v323_v19, %v331_v20 }
 0x10e   :  { %1931 = vmatpush1.bf16.msra.mxu0 %v2821_v23  ;;  %1768 = vmatprep.subr.bf16.mxu1 %v2826_v24 }
 0x10f   :  { %1932 = vmatprep.subr.bf16.mxu0 %v2829_v25 }
 0x111   :  { %1769 = vmatpush1.bf16.msra.mxu1 %v2824_v26 }
 0x112   :  { %1933 = vmatpush1.bf16.msra.mxu0 %v2827_v27  ;;  %2383 = vmatprep.subr.bf16.mxu1 %v2382_v34 }
 0x114   :  { %1771 = vmatmul.mubr.bf16.vlgmr.msra.gmra.mrb[0].mxu1 %v57_v30 }
 0x115   :  { %1935 = vmatmul.mubr.bf16.vlgmr.msra.gmra.mrb[0].mxu0 %v65_v31  ;;  %2385 = vmatpush3.bf16.msra.mxu1 %v2384_v37 }
 0x116   :  { %2387 = vmatprep.subr.bf16.mxu1 %v2386_v40 }
 0x119   :  { %2389 = vmatpush3.bf16.msra.mxu1 %v2388_v43 }
 0x11a   :  { %2391 = vmatprep.subr.bf16.mxu1 %v2390_v46 }
 0x11d   :  { %2393 = vmatpush3.bf16.msra.mxu1 %v2392_v49 }
 0x11e   :  { %2395 = vmatprep.subr.bf16.mxu1 %v2394_v52 }
 0x121   :  { %2397 = vmatpush3.bf16.msra.mxu1 %v2396_v55 }
 0x122   :  { %2399 = vmatprep.subr.bf16.mxu1 %v2398_v58 }
 0x125   :  { %2401 = vmatpush3.bf16.msra.mxu1 %v2400_v61 }
 0x126   :  { %2403 = vmatprep.subr.bf16.mxu1 %v2402_v0 }
 0x129   :  { %2405 = vmatpush3.bf16.msra.mxu1 %v2404_v3 }
 0x12a   :  { %2407 = vmatprep.subr.bf16.mxu1 %v2406_v7 }
 0x12d   :  { %2409 = vmatpush3.bf16.msra.mxu1 %v2408_v11 }
 0x12e   :  { %2411 = vmatprep.subr.bf16.mxu1 %v2410_v12 }
 0x131   :  { %2413 = vmatpush3.bf16.msra.mxu1 %v2412_v15 }
 0x1e7   :  { %v1772_v23 = vpop.f32.mrb[0].mxu1 }
 0x1e8   :  { %v1936_v24 = vpop.f32.mrb[0].mxu0  ;;  %v2414_v25 = vadd.f32 %v1772_v23, %v328_v21  ;;  %v1774_v26 = vpop.f32.mrb[1].mxu1 }
 0x1e9   :  { %v1938_v27 = vpop.f32.mrb[1].mxu0  ;;  %v2416_v28 = vadd.f32 %v1774_v26, %v332_v22  ;;  %v1776_v29 = vpop.f32.mrb[2].mxu1 }
 0x1ea   :  { %v1940_v30 = vpop.f32.mrb[2].mxu0  ;;  %v2415_v31 = vadd.f32 %v2414_v25, %v1936_v24  ;;  %v1777_v32 = vpop.f32.mrb[3].mxu1 }
 0x1eb   :  { %v1941_v33 = vpop.f32.mrb[3].mxu0  ;;  %v2417_v34 = vadd.f32 %v2416_v28, %v1938_v27 }
 0x1ec   :  { %v2343_v35 = vmul.f32 -1.442695, %v2415_v31 }
 0x1ed   :  { %v2344_v36 = vmul.f32 -1.442695, %v2417_v34 }
 0x1ee   :  { %2830 = vpow2.f32 %v2343_v35 }
 0x1ef   :  { %2832 = vpow2.f32 %v2344_v36 }
 0x1f8   :  { %v2831_v37 = vpop.eup %2830 }
 0x1f9   :  { %v2833_v38 = vpop.eup %2832  ;;  %v1949_v39 = vadd.f32 1.0, %v2831_v37 }
 0x1fa   :  { %v1950_v40 = vadd.f32 1.0, %v2833_v38 }
 0x1fc   :  { %2834 = vrcp.f32 %v1950_v40 }
 0x1fd   :  { %2836 = vrcp.f32 %v1949_v39 }
 0x206   :  { %v2835_v41 = vpop.eup %2834 }
 0x207   :  { %v2837_v42 = vpop.eup %2836  ;;  %2058 = vmatprep.mubr.f32.mxu1 %v2835_v41 }
 0x208   :  { %2059 = vmatmul.mubr.f32.vlgmr.msra.gmra.mrb[4].mxu1 %v2837_v42 }
 0x2db   :  { %v2379_v43 = vpop.f32.mrb[4].mxu1 }
 0x2dc   :  { %v2380_v45 = vpop.f32.mrb[5].mxu1 }
 0x2dd   :  { %v2381_v46 = vadd.f32 %v2380_v45, %v2379_v43 }
 0x2df   :  { %v2061_v47 = vadd.f32 %v2381_v46, %v2345_v44 }
 0x2e1   :  { %v2346_v48 = vmul.f32 -1.442695, %v2061_v47 }
 0x2e3   :  { %2838 = vpow2.f32 %v2346_v48 }
 0x2ed   :  { %v2839_v49 = vpop.eup %2838 }
 0x2ee   :  { %v2067_v50 = vadd.f32 1.0, %v2839_v49 }
 0x2f0   :  { %2840 = vrcp.f32 %v2067_v50 }
 0x2fa   :  { %v2841_v51 = vpop.eup %2840 }
 0x2fb   :  { %2071 = vst.msk [vmem:[#allocation5] sm:$0xff] %vm2070_vm0, %v2841_v51 }
 0x2fc   :  { %2875 = shalt.err (!%p2872_p12)
}
 0x2fd   :  { %s2876_s27 = scalar_lea.hbm %s3103_s5, 128 }
 0x2fe   :  { %p2877_p13 = scmp.ne.s32.totalorder %s3103_s5, %s2876_s27  ;;  %p2880_p0 = scmp.lt.u32.totalorder %s2876_s27, %s3103_s5 }
 0x300   :  { %p2882_p1 = pnand %p2880_p0, %p2877_p13 }
 0x302   :  { %2885 = shalt.err (!%p2882_p1)
}
 0x303   :  { %2081 = dma.vmem_to_hbm [thread:$0]  %s2079_s24, 128, %s3103_s5, [#allocation4]  }
 0x304   :  { %2888 = dma.done.wait [#allocation4], 128  }
 0x305   :  { %2889 = vsyncadd [#allocation4], 4294967168 }
 0x306   :  { %2085 = vsyncpa [#allocation3], 1 }
 0x307   :  { %2086 = vsyncpa [#allocation4], 1 }

// kernel: tpu_custom_call.1
= control target key start
LH: loop header
LB: loop body
LE: loop exit
PB: predicated region body
PF: predicated region fallthrough
CT: control target
= control target key end

     0   :  { %10 = vsyncpa [#allocation3], 0  ;;  %s3098_s0 = inlined_call_operand.vmem [shape: f32[8,2048], index: 0, kind: input, shape index: {}]   ;;  %s3099_s1 = inlined_call_operand.hbm [shape: bf16[2048,256], index: 1, kind: input, shape index: {}]   ;;  %s3100_s2 = inlined_call_operand.vmem [shape: f32[1,256], index: 2, kind: input, shape index: {}]   ;;  %s3101_s3 = inlined_call_operand.vmem [shape: f32[256,9], index: 3, kind: input, shape index: {}]   ;;  %s3102_s4 = inlined_call_operand.vmem [shape: f32[1,9], index: 4, kind: input, shape index: {}]   ;;  %s3103_s5 = inlined_call_operand.hbm [shape: f32[8,9], index: 5, kind: output, shape index: {}]  }
   0x1   :  { %11 = vsyncpa [#allocation4], 0  ;;  %s2890_s18 = smov [#allocation2]   ;;  %s2842_s22 = scalar_lea.hbm %s3099_s1, 32768 }
   0x2   :  { %s19_s19 = sshll.u32 %s2890_s18, 4  ;;  %p2843_p0 = scmp.ne.s32.totalorder %s3099_s1, %s2842_s22  ;;  %s20_s19 = int_to_ptr.vmem [resolvable:$true] %s19_s19 }
   0x3   :  { %p2846_p1 = scmp.lt.u32.totalorder %s2842_s22, %s3099_s1 }
   0x5   :  { %p2848_p2 = pnand %p2846_p1, %p2843_p0 }
   0x7   :  { %2851 = shalt.err (!%p2848_p2)
}
   0x8   :  { %s2852_s27 = scalar_lea.vmem %s20_s19, 32768  ;;  %p2857_p4 = scmp.lt.s32.totalorder %s20_s19, %s20_s19 }
   0x9   :  { %p2853_p3 = scmp.ne.s32.totalorder %s20_s19, %s2852_s27  ;;  %p2858_p5 = scmp.lt.s32.totalorder %s2852_s27, %s2852_s27 }
   0xb   :  { %p2859_p6 = por %p2858_p5, %p2857_p4 }
   0xd   :  { %p2860_p7 = pnand %p2859_p6, %p2853_p3 }
   0xf   :  { %2863 = shalt.err (!%p2860_p7)
}
  0x10   :  { %s2891_s28 = smov 128   ;;  %s2892_s29 = smov 8  }
  0x11   :  { %25 = dma.hbm_to_vmem [thread:$0]  %s3099_s1, 32768, %s20_s19, [#allocation3], %s2891_s28, %s2891_s28, %s2892_s29  }
  0x12   :  { %2886 = dma.done.wait [#allocation3], 32768  }
  0x13   :  { %2887 = vsyncadd [#allocation3], 4294934528  ;;  %v2446_v0 = vld [vmem:[#allocation2 + $0x4] ss:$8 sps:$4 sm:$0xff]   ;;  %v2450_v2 = vld [vmem:[#allocation2] ss:$8 sps:$4 sm:$0xff]  }
  0x14   :  { %v2448_v1 = vld [vmem:[#allocation2 + $0x404] ss:$8 sps:$4 sm:$0xff]   ;;  %1615 = vmatprep.subr.bf16.mxu1 %v2446_v0  ;;  %v2451_v3 = vld [vmem:[#allocation2 + $0x400] ss:$8 sps:$4 sm:$0xff]   ;;  %v2452_v4 = vld [vmem:[#allocation2 + $0x14] ss:$8 sps:$4 sm:$0xff]  }
  0x15   :  { %1779 = vmatprep.subr.bf16.mxu0 %v2448_v1  ;;  %1616 = vmatpush1.bf16.msra.mxu1 %v2450_v2  ;;  %v2454_v5 = vld [vmem:[#allocation2 + $0x414] ss:$8 sps:$4 sm:$0xff]   ;;  %v2456_v6 = vld [vmem:[#allocation2 + $0x10] ss:$8 sps:$4 sm:$0xff]   ;;  %v2458_v8 = vld [vmem:[#allocation2 + $0x24] ss:$8 sps:$4 sm:$0xff]  }
  0x16   :  { %1780 = vmatpush1.bf16.msra.mxu0 %v2451_v3  ;;  %1617 = vmatprep.subr.bf16.mxu1 %v2452_v4  ;;  %v2457_v7 = vld [vmem:[#allocation2 + $0x410] ss:$8 sps:$4 sm:$0xff]   ;;  %v2460_v9 = vld [vmem:[#allocation2 + $0x424] ss:$8 sps:$4 sm:$0xff]   ;;  %v2462_v10 = vld [vmem:[#allocation2 + $0x20] ss:$8 sps:$4 sm:$0xff]  }
  0x17   :  { %1781 = vmatprep.subr.bf16.mxu0 %v2454_v5  ;;  %v2463_v11 = vld [vmem:[#allocation2 + $0x420] ss:$8 sps:$4 sm:$0xff]   ;;  %v2464_v12 = vld [vmem:[#allocation2 + $0x34] ss:$8 sps:$4 sm:$0xff]   ;;  %v2468_v14 = vld [vmem:[#allocation2 + $0x30] ss:$8 sps:$4 sm:$0xff]  }
  0x18   :  { %v2466_v13 = vld [vmem:[#allocation2 + $0x434] ss:$8 sps:$4 sm:$0xff]   ;;  %v2469_v15 = vld [vmem:[#allocation2 + $0x430] ss:$8 sps:$4 sm:$0xff]   ;;  %v2470_v16 = vld [vmem:[#allocation2 + $0x44] ss:$8 sps:$4 sm:$0xff]  }
  0x19   :  { %1618 = vmatpush1.bf16.msra.mxu1 %v2456_v6  ;;  %v2472_v17 = vld [vmem:[#allocation2 + $0x444] ss:$8 sps:$4 sm:$0xff]   ;;  %v2474_v18 = vld [vmem:[#allocation2 + $0x40] ss:$8 sps:$4 sm:$0xff]   ;;  %v2476_v20 = vld [vmem:[#allocation2 + $0x54] ss:$8 sps:$4 sm:$0xff]  }
  0x1a   :  { %1782 = vmatpush1.bf16.msra.mxu0 %v2457_v7  ;;  %1619 = vmatprep.subr.bf16.mxu1 %v2458_v8  ;;  %v2475_v19 = vld [vmem:[#allocation2 + $0x440] ss:$8 sps:$4 sm:$0xff]   ;;  %v2478_v21 = vld [vmem:[#allocation2 + $0x454] ss:$8 sps:$4 sm:$0xff]   ;;  %v2480_v22 = vld [vmem:[#allocation2 + $0x50] ss:$8 sps:$4 sm:$0xff]  }
  0x1b   :  { %1783 = vmatprep.subr.bf16.mxu0 %v2460_v9  ;;  %v2481_v23 = vld [vmem:[#allocation2 + $0x450] ss:$8 sps:$4 sm:$0xff]   ;;  %v2482_v24 = vld [vmem:[#allocation2 + $0x64] ss:$8 sps:$4 sm:$0xff]   ;;  %v2486_v26 = vld [vmem:[#allocation2 + $0x60] ss:$8 sps:$4 sm:$0xff]  }
  0x1c   :  { %v2484_v25 = vld [vmem:[#allocation2 + $0x464] ss:$8 sps:$4 sm:$0xff]   ;;  %v2487_v27 = vld [vmem:[#allocation2 + $0x460] ss:$8 sps:$4 sm:$0xff]   ;;  %v2488_v28 = vld [vmem:[#allocation2 + $0x74] ss:$8 sps:$4 sm:$0xff]  }
  0x1d   :  { %1620 = vmatpush1.bf16.msra.mxu1 %v2462_v10  ;;  %v2490_v29 = vld [vmem:[#allocation2 + $0x474] ss:$8 sps:$4 sm:$0xff]   ;;  %v2492_v30 = vld [vmem:[#allocation2 + $0x70] ss:$8 sps:$4 sm:$0xff]   ;;  %v2494_v32 = vld [vmem:[#allocation2 + $0x84] ss:$8 sps:$4 sm:$0xff]  }
  0x1e   :  { %1784 = vmatpush1.bf16.msra.mxu0 %v2463_v11  ;;  %1621 = vmatprep.subr.bf16.mxu1 %v2464_v12  ;;  %v2493_v31 = vld [vmem:[#allocation2 + $0x470] ss:$8 sps:$4 sm:$0xff]   ;;  %v2496_v33 = vld [vmem:[#allocation2 + $0x484] ss:$8 sps:$4 sm:$0xff]   ;;  %v2498_v34 = vld [vmem:[#allocation2 + $0x80] ss:$8 sps:$4 sm:$0xff]  }
  0x1f   :  { %1785 = vmatprep.subr.bf16.mxu0 %v2466_v13  ;;  %v2499_v35 = vld [vmem:[#allocation2 + $0x480] ss:$8 sps:$4 sm:$0xff]   ;;  %v2500_v36 = vld [vmem:[#allocation2 + $0x94] ss:$8 sps:$4 sm:$0xff]   ;;  %v2504_v38 = vld [vmem:[#allocation2 + $0x90] ss:$8 sps:$4 sm:$0xff]  }
  0x20   :  { %v2502_v37 = vld [vmem:[#allocation2 + $0x494] ss:$8 sps:$4 sm:$0xff]   ;;  %v2505_v39 = vld [vmem:[#allocation2 + $0x490] ss:$8 sps:$4 sm:$0xff]   ;;  %v2506_v40 = vld [vmem:[#allocation2 + $0xa4] ss:$8 sps:$4 sm:$0xff]  }
  0x21   :  { %1622 = vmatpush1.bf16.msra.mxu1 %v2468_v14  ;;  %v2508_v41 = vld [vmem:[#allocation2 + $0x4a4] ss:$8 sps:$4 sm:$0xff]   ;;  %v2510_v42 = vld [vmem:[#allocation2 + $0xa0] ss:$8 sps:$4 sm:$0xff]   ;;  %v2512_v44 = vld [vmem:[#allocation2 + $0xb4] ss:$8 sps:$4 sm:$0xff]  }
  0x22   :  { %1786 = vmatpush1.bf16.msra.mxu0 %v2469_v15  ;;  %1623 = vmatprep.subr.bf16.mxu1 %v2470_v16  ;;  %v2511_v43 = vld [vmem:[#allocation2 + $0x4a0] ss:$8 sps:$4 sm:$0xff]   ;;  %v2514_v45 = vld [vmem:[#allocation2 + $0x4b4] ss:$8 sps:$4 sm:$0xff]   ;;  %v2516_v47 = vld [vmem:[#allocation2 + $0xb0] ss:$8 sps:$4 sm:$0xff]  }
  0x23   :  { %1787 = vmatprep.subr.bf16.mxu0 %v2472_v17  ;;  %v36_v46 = vld [vmem:[%s3098_s0 + $0x8] sm:$0xff]  ;;  %v2517_v49 = vld [vmem:[#allocation2 + $0x4b0] ss:$8 sps:$4 sm:$0xff]   ;;  %v2524_v56 = vld [vmem:[#allocation2 + $0xd4] ss:$8 sps:$4 sm:$0xff]   ;;  %s2893_s23 = smov [#allocation5]  }
  0x24   :  { %v52_v48 = vpack.c.bf16 %v36_v46, %v36_v46  ;;  %v44_v50 = vld [vmem:[%s3098_s0 + $0x48] sm:$0xff]  ;;  %v2526_v57 = vld [vmem:[#allocation2 + $0x4d4] ss:$8 sps:$4 sm:$0xff]   ;;  %v2528_v58 = vld [vmem:[#allocation2 + $0xd0] ss:$8 sps:$4 sm:$0xff]   ;;  %s2078_s24 = sshll.u32 %s2893_s23, 4  ;;  %s2079_s24 = int_to_ptr.vmem [resolvable:$true] %s2078_s24 }
  0x25   :  { %1624 = vmatpush1.bf16.msra.mxu1 %v2474_v18  ;;  %v2518_v51 = vld [vmem:[#allocation2 + $0xc4] ss:$8 sps:$4 sm:$0xff]   ;;  %v60_v53 = vpack.c.bf16 %v44_v50, %v44_v50  ;;  %v2522_v54 = vld [vmem:[#allocation2 + $0xc0] ss:$8 sps:$4 sm:$0xff]   ;;  %v2529_v59 = vld [vmem:[#allocation2 + $0x4d0] ss:$8 sps:$4 sm:$0xff]   ;;  %p2869_p9 = scmp.lt.s32.totalorder %s2079_s24, %s2079_s24 }
  0x26   :  { %1788 = vmatpush1.bf16.msra.mxu0 %v2475_v19  ;;  %1625 = vmatprep.subr.bf16.mxu1 %v2476_v20  ;;  %v2520_v52 = vld [vmem:[#allocation2 + $0x4c4] ss:$8 sps:$4 sm:$0xff]   ;;  %v2523_v55 = vld [vmem:[#allocation2 + $0x4c0] ss:$8 sps:$4 sm:$0xff]   ;;  %v2536_v0 = vld [vmem:[#allocation2 + $0xf4] ss:$8 sps:$4 sm:$0xff]  }
  0x27   :  { %1789 = vmatprep.subr.bf16.mxu0 %v2478_v21  ;;  %1647 = vmatprep.mubr.bf16.mxu1 %v52_v48  ;;  %v2530_v60 = vld [vmem:[#allocation2 + $0xe4] ss:$8 sps:$4 sm:$0xff]   ;;  %v2534_v62 = vld [vmem:[#allocation2 + $0xe0] ss:$8 sps:$4 sm:$0xff]   ;;  %v2538_v1 = vld [vmem:[#allocation2 + $0x4f4] ss:$8 sps:$4 sm:$0xff]  }
  0x28   :  { %1811 = vmatprep.mubr.bf16.mxu0 %v60_v53  ;;  %v2532_v61 = vld [vmem:[#allocation2 + $0x4e4] ss:$8 sps:$4 sm:$0xff]   ;;  %v2535_v63 = vld [vmem:[#allocation2 + $0x4e0] ss:$8 sps:$4 sm:$0xff]   ;;  %v2540_v2 = vld [vmem:[#allocation2 + $0xf0] ss:$8 sps:$4 sm:$0xff]  }
  0x29   :  { %1626 = vmatpush1.bf16.msra.mxu1 %v2480_v22  ;;  %v2541_v3 = vld [vmem:[#allocation2 + $0x4f0] ss:$8 sps:$4 sm:$0xff]   ;;  %v2544_v4 = vld [vmem:[#allocation2 + $0x104] ss:$8 sps:$4 sm:$0xff]   ;;  %v2542_v8 = vld [vmem:[#allocation2 + $0x100] ss:$8 sps:$4 sm:$0xff]  }
  0x2a   :  { %1790 = vmatpush1.bf16.msra.mxu0 %v2481_v23  ;;  %1627 = vmatprep.subr.bf16.mxu1 %v2482_v24  ;;  %v35_v5 = vld [vmem:[%s3098_s0] sm:$0xff]  ;;  %v2550_v12 = vld [vmem:[#allocation2 + $0x114] ss:$8 sps:$4 sm:$0xff]   ;;  %v2548_v14 = vld [vmem:[#allocation2 + $0x110] ss:$8 sps:$4 sm:$0xff]   ;;  %vm2070_vm0 = vcmask 72704  }
  0x2b   :  { %1791 = vmatprep.subr.bf16.mxu0 %v2484_v25  ;;  %v43_v6 = vld [vmem:[%s3098_s0 + $0x40] sm:$0xff]  ;;  %v51_v10 = vpack.c.bf16 %v35_v5, %v35_v5  ;;  %v2553_v13 = vld [vmem:[#allocation2 + $0x514] ss:$8 sps:$4 sm:$0xff]   ;;  %v2551_v15 = vld [vmem:[#allocation2 + $0x510] ss:$8 sps:$4 sm:$0xff]   ;;  %s2864_s25 = scalar_lea.vmem %s2079_s24, 128 }
  0x2c   :  { %v2547_v7 = vld [vmem:[#allocation2 + $0x504] ss:$8 sps:$4 sm:$0xff]   ;;  %v2545_v9 = vld [vmem:[#allocation2 + $0x500] ss:$8 sps:$4 sm:$0xff]   ;;  %v59_v11 = vpack.c.bf16 %v43_v6, %v43_v6  ;;  %v2562_v20 = vld [vmem:[#allocation2 + $0x134] ss:$8 sps:$4 sm:$0xff]   ;;  %p2865_p8 = scmp.ne.s32.totalorder %s2079_s24, %s2864_s25  ;;  %p2870_p10 = scmp.lt.s32.totalorder %s2864_s25, %s2864_s25 }
  0x2d   :  { %1628 = vmatpush1.bf16.msra.mxu1 %v2486_v26  ;;  %v2556_v16 = vld [vmem:[#allocation2 + $0x124] ss:$8 sps:$4 sm:$0xff]   ;;  %v2554_v18 = vld [vmem:[#allocation2 + $0x120] ss:$8 sps:$4 sm:$0xff]   ;;  %v2565_v21 = vld [vmem:[#allocation2 + $0x534] ss:$8 sps:$4 sm:$0xff]  }
  0x2e   :  { %1792 = vmatpush1.bf16.msra.mxu0 %v2487_v27  ;;  %1629 = vmatprep.subr.bf16.mxu1 %v2488_v28  ;;  %v2559_v17 = vld [vmem:[#allocation2 + $0x524] ss:$8 sps:$4 sm:$0xff]   ;;  %v2557_v19 = vld [vmem:[#allocation2 + $0x520] ss:$8 sps:$4 sm:$0xff]   ;;  %v2560_v22 = vld [vmem:[#allocation2 + $0x130] ss:$8 sps:$4 sm:$0xff]   ;;  %p2871_p11 = por %p2870_p10, %p2869_p9 }
  0x2f   :  { %1793 = vmatprep.subr.bf16.mxu0 %v2490_v29  ;;  %v2563_v23 = vld [vmem:[#allocation2 + $0x530] ss:$8 sps:$4 sm:$0xff]   ;;  %v2568_v24 = vld [vmem:[#allocation2 + $0x144] ss:$8 sps:$4 sm:$0xff]   ;;  %v2566_v26 = vld [vmem:[#allocation2 + $0x140] ss:$8 sps:$4 sm:$0xff]  }
  0x30   :  { %v2571_v25 = vld [vmem:[#allocation2 + $0x544] ss:$8 sps:$4 sm:$0xff]   ;;  %v2569_v27 = vld [vmem:[#allocation2 + $0x540] ss:$8 sps:$4 sm:$0xff]   ;;  %v2574_v28 = vld [vmem:[#allocation2 + $0x154] ss:$8 sps:$4 sm:$0xff]   ;;  %p2872_p12 = pnand %p2871_p11, %p2865_p8 }
  0x31   :  { %1630 = vmatpush1.bf16.msra.mxu1 %v2492_v30  ;;  %v2577_v29 = vld [vmem:[#allocation2 + $0x554] ss:$8 sps:$4 sm:$0xff]   ;;  %v2572_v30 = vld [vmem:[#allocation2 + $0x150] ss:$8 sps:$4 sm:$0xff]   ;;  %v2590_v46 = vld [vmem:[#allocation2 + $0x180] ss:$8 sps:$4 sm:$0xff]  }
  0x32   :  { %1794 = vmatpush1.bf16.msra.mxu0 %v2493_v31  ;;  %1631 = vmatprep.subr.bf16.mxu1 %v2494_v32  ;;  %v2575_v31 = vld [vmem:[#allocation2 + $0x550] ss:$8 sps:$4 sm:$0xff]   ;;  %v2580_v32 = vld [vmem:[#allocation2 + $0x164] ss:$8 sps:$4 sm:$0xff]   ;;  %v2598_v48 = vld [vmem:[#allocation2 + $0x194] ss:$8 sps:$4 sm:$0xff]  }
  0x33   :  { %1795 = vmatprep.subr.bf16.mxu0 %v2496_v33  ;;  %v2583_v33 = vld [vmem:[#allocation2 + $0x564] ss:$8 sps:$4 sm:$0xff]   ;;  %v2596_v50 = vld [vmem:[#allocation2 + $0x190] ss:$8 sps:$4 sm:$0xff]   ;;  %v2626_v6 = vld [vmem:[#allocation2 + $0x1e0] ss:$8 sps:$4 sm:$0xff]  }
  0x34   :  { %v2607_v53 = vld [vmem:[#allocation2 + $0x5a4] ss:$8 sps:$4 sm:$0xff]  }
  0x35   :  { %1632 = vmatpush1.bf16.msra.mxu1 %v2498_v34  ;;  %v38_v34 = vld [vmem:[%s3098_s0 + $0x18] sm:$0xff]  ;;  %v2631_v5 = vld [vmem:[#allocation2 + $0x5e4] ss:$8 sps:$4 sm:$0xff]  }
  0x36   :  { %1796 = vmatpush1.bf16.msra.mxu0 %v2499_v35  ;;  %1633 = vmatprep.subr.bf16.mxu1 %v2500_v36  ;;  %v2578_v35 = vld [vmem:[#allocation2 + $0x160] ss:$8 sps:$4 sm:$0xff]   ;;  %v54_v36 = vpack.c.bf16 %v38_v34, %v38_v34  ;;  %v2656_v34 = vld [vmem:[#allocation2 + $0x230] ss:$8 sps:$4 sm:$0xff]  }
  0x37   :  { %1797 = vmatprep.subr.bf16.mxu0 %v2502_v37  ;;  %v2581_v37 = vld [vmem:[#allocation2 + $0x560] ss:$8 sps:$4 sm:$0xff]  }
  0x39   :  { %1634 = vmatpush1.bf16.msra.mxu1 %v2504_v38  ;;  %v46_v38 = vld [vmem:[%s3098_s0 + $0x58] sm:$0xff] }
  0x3a   :  { %1798 = vmatpush1.bf16.msra.mxu0 %v2505_v39  ;;  %1635 = vmatprep.subr.bf16.mxu1 %v2506_v40  ;;  %v2586_v39 = vld [vmem:[#allocation2 + $0x174] ss:$8 sps:$4 sm:$0xff]  }
  0x3b   :  { %1799 = vmatprep.subr.bf16.mxu0 %v2508_v41  ;;  %v2589_v40 = vld [vmem:[#allocation2 + $0x574] ss:$8 sps:$4 sm:$0xff]   ;;  %v62_v41 = vpack.c.bf16 %v46_v38, %v46_v38  ;;  %v2662_v38 = vld [vmem:[#allocation2 + $0x240] ss:$8 sps:$4 sm:$0xff]  }
  0x3d   :  { %1636 = vmatpush1.bf16.msra.mxu1 %v2510_v42  ;;  %v2584_v42 = vld [vmem:[#allocation2 + $0x170] ss:$8 sps:$4 sm:$0xff]  }
  0x3e   :  { %1800 = vmatpush1.bf16.msra.mxu0 %v2511_v43  ;;  %1637 = vmatprep.subr.bf16.mxu1 %v2512_v44  ;;  %v2587_v43 = vld [vmem:[#allocation2 + $0x570] ss:$8 sps:$4 sm:$0xff]   ;;  %v2592_v44 = vld [vmem:[#allocation2 + $0x184] ss:$8 sps:$4 sm:$0xff]  }
  0x3f   :  { %1801 = vmatprep.subr.bf16.mxu0 %v2514_v45  ;;  %v2595_v45 = vld [vmem:[#allocation2 + $0x584] ss:$8 sps:$4 sm:$0xff]  }
  0x41   :  { %1638 = vmatpush1.bf16.msra.mxu1 %v2516_v47  ;;  %v2593_v47 = vld [vmem:[#allocation2 + $0x580] ss:$8 sps:$4 sm:$0xff]  }
  0x42   :  { %1802 = vmatpush1.bf16.msra.mxu0 %v2517_v49  ;;  %1639 = vmatprep.subr.bf16.mxu1 %v2518_v51  ;;  %v2601_v49 = vld [vmem:[#allocation2 + $0x594] ss:$8 sps:$4 sm:$0xff]   ;;  %v2599_v51 = vld [vmem:[#allocation2 + $0x590] ss:$8 sps:$4 sm:$0xff]  }
  0x43   :  { %1803 = vmatprep.subr.bf16.mxu0 %v2520_v52  ;;  %v2604_v52 = vld [vmem:[#allocation2 + $0x1a4] ss:$8 sps:$4 sm:$0xff]  }
  0x45   :  { %1640 = vmatpush1.bf16.msra.mxu1 %v2522_v54  ;;  %v2602_v54 = vld [vmem:[#allocation2 + $0x1a0] ss:$8 sps:$4 sm:$0xff]  }
  0x46   :  { %1804 = vmatpush1.bf16.msra.mxu0 %v2523_v55  ;;  %1641 = vmatprep.subr.bf16.mxu1 %v2524_v56  ;;  %v2605_v55 = vld [vmem:[#allocation2 + $0x5a0] ss:$8 sps:$4 sm:$0xff]   ;;  %v2610_v56 = vld [vmem:[#allocation2 + $0x1b4] ss:$8 sps:$4 sm:$0xff]  }
  0x47   :  { %1805 = vmatprep.subr.bf16.mxu0 %v2526_v57  ;;  %v2613_v57 = vld [vmem:[#allocation2 + $0x5b4] ss:$8 sps:$4 sm:$0xff]  }
  0x49   :  { %1642 = vmatpush1.bf16.msra.mxu1 %v2528_v58  ;;  %v2608_v58 = vld [vmem:[#allocation2 + $0x1b0] ss:$8 sps:$4 sm:$0xff]  }
  0x4a   :  { %1806 = vmatpush1.bf16.msra.mxu0 %v2529_v59  ;;  %1643 = vmatprep.subr.bf16.mxu1 %v2530_v60  ;;  %v2611_v59 = vld [vmem:[#allocation2 + $0x5b0] ss:$8 sps:$4 sm:$0xff]   ;;  %v2616_v60 = vld [vmem:[#allocation2 + $0x1c4] ss:$8 sps:$4 sm:$0xff]  }
  0x4b   :  { %1807 = vmatprep.subr.bf16.mxu0 %v2532_v61  ;;  %v2619_v61 = vld [vmem:[#allocation2 + $0x5c4] ss:$8 sps:$4 sm:$0xff]  }
  0x4d   :  { %1644 = vmatpush1.bf16.msra.mxu1 %v2534_v62  ;;  %v2614_v62 = vld [vmem:[#allocation2 + $0x1c0] ss:$8 sps:$4 sm:$0xff]  }
  0x4e   :  { %1808 = vmatpush1.bf16.msra.mxu0 %v2535_v63  ;;  %1645 = vmatprep.subr.bf16.mxu1 %v2536_v0  ;;  %v2617_v63 = vld [vmem:[#allocation2 + $0x5c0] ss:$8 sps:$4 sm:$0xff]   ;;  %v2622_v0 = vld [vmem:[#allocation2 + $0x1d4] ss:$8 sps:$4 sm:$0xff]  }
  0x4f   :  { %1809 = vmatprep.subr.bf16.mxu0 %v2538_v1  ;;  %v2625_v1 = vld [vmem:[#allocation2 + $0x5d4] ss:$8 sps:$4 sm:$0xff]  }
  0x51   :  { %1646 = vmatpush1.bf16.msra.mxu1 %v2540_v2  ;;  %v2620_v2 = vld [vmem:[#allocation2 + $0x1d0] ss:$8 sps:$4 sm:$0xff]  }
  0x52   :  { %1810 = vmatpush1.bf16.msra.mxu0 %v2541_v3  ;;  %1656 = vmatprep.subr.bf16.mxu1 %v2544_v4  ;;  %v2623_v3 = vld [vmem:[#allocation2 + $0x5d0] ss:$8 sps:$4 sm:$0xff]   ;;  %v2628_v4 = vld [vmem:[#allocation2 + $0x1e4] ss:$8 sps:$4 sm:$0xff]  }
  0x53   :  { %1820 = vmatprep.subr.bf16.mxu0 %v2547_v7  ;;  %v2629_v7 = vld [vmem:[#allocation2 + $0x5e0] ss:$8 sps:$4 sm:$0xff]  }
  0x54   :  { %1648 = vmatmul.mubr.bf16.vlgmr.msra.gmra.mrb[0].mxu1 %v51_v10  ;;  %v2632_v10 = vld [vmem:[#allocation2 + $0x1f0] ss:$8 sps:$4 sm:$0xff]  }
  0x55   :  { %1812 = vmatmul.mubr.bf16.vlgmr.msra.gmra.mrb[0].mxu0 %v59_v11  ;;  %1657 = vmatpush1.bf16.msra.mxu1 %v2542_v8  ;;  %v2634_v8 = vld [vmem:[#allocation2 + $0x1f4] ss:$8 sps:$4 sm:$0xff]   ;;  %v2635_v11 = vld [vmem:[#allocation2 + $0x5f0] ss:$8 sps:$4 sm:$0xff]  }
  0x56   :  { %1821 = vmatpush1.bf16.msra.mxu0 %v2545_v9  ;;  %1658 = vmatprep.subr.bf16.mxu1 %v2550_v12  ;;  %v2637_v9 = vld [vmem:[#allocation2 + $0x5f4] ss:$8 sps:$4 sm:$0xff]   ;;  %v2640_v12 = vld [vmem:[#allocation2 + $0x204] ss:$8 sps:$4 sm:$0xff]  }
  0x57   :  { %1822 = vmatprep.subr.bf16.mxu0 %v2553_v13  ;;  %1688 = vmatprep.mubr.bf16.mxu1 %v54_v36  ;;  %v37_v13 = vld [vmem:[%s3098_s0 + $0x10] sm:$0xff]  ;;  %v2664_v36 = vld [vmem:[#allocation2 + $0x244] ss:$8 sps:$4 sm:$0xff]  }
  0x58   :  { %1852 = vmatprep.mubr.bf16.mxu0 %v62_v41  ;;  %v2673_v41 = vld [vmem:[#allocation2 + $0x654] ss:$8 sps:$4 sm:$0xff]  }
  0x59   :  { %1659 = vmatpush1.bf16.msra.mxu1 %v2548_v14  ;;  %v45_v14 = vld [vmem:[%s3098_s0 + $0x50] sm:$0xff] }
  0x5a   :  { %1823 = vmatpush1.bf16.msra.mxu0 %v2551_v15  ;;  %1660 = vmatprep.subr.bf16.mxu1 %v2556_v16  ;;  %v2643_v15 = vld [vmem:[#allocation2 + $0x604] ss:$8 sps:$4 sm:$0xff]   ;;  %v2638_v16 = vld [vmem:[#allocation2 + $0x200] ss:$8 sps:$4 sm:$0xff]  }
  0x5b   :  { %1824 = vmatprep.subr.bf16.mxu0 %v2559_v17  ;;  %v2641_v17 = vld [vmem:[#allocation2 + $0x600] ss:$8 sps:$4 sm:$0xff]  }
  0x5d   :  { %1661 = vmatpush1.bf16.msra.mxu1 %v2554_v18  ;;  %v53_v18 = vpack.c.bf16 %v37_v13, %v37_v13  ;;  %v2727_v13 = vld [vmem:[#allocation2 + $0x6e4] ss:$8 sps:$4 sm:$0xff]  }
  0x5e   :  { %1825 = vmatpush1.bf16.msra.mxu0 %v2557_v19  ;;  %1662 = vmatprep.subr.bf16.mxu1 %v2562_v20  ;;  %v61_v19 = vpack.c.bf16 %v45_v14, %v45_v14  ;;  %v2646_v20 = vld [vmem:[#allocation2 + $0x214] ss:$8 sps:$4 sm:$0xff]   ;;  %v2722_v14 = vld [vmem:[#allocation2 + $0x2e0] ss:$8 sps:$4 sm:$0xff]  }
  0x5f   :  { %1826 = vmatprep.subr.bf16.mxu0 %v2565_v21  ;;  %v2649_v21 = vld [vmem:[#allocation2 + $0x614] ss:$8 sps:$4 sm:$0xff]  }
  0x61   :  { %1663 = vmatpush1.bf16.msra.mxu1 %v2560_v22  ;;  %v40_v22 = vld [vmem:[%s3098_s0 + $0x28] sm:$0xff] }
  0x62   :  { %1827 = vmatpush1.bf16.msra.mxu0 %v2563_v23  ;;  %1664 = vmatprep.subr.bf16.mxu1 %v2568_v24  ;;  %v2644_v23 = vld [vmem:[#allocation2 + $0x210] ss:$8 sps:$4 sm:$0xff]   ;;  %v56_v24 = vpack.c.bf16 %v40_v22, %v40_v22  ;;  %v2736_v22 = vld [vmem:[#allocation2 + $0x304] ss:$8 sps:$4 sm:$0xff]  }
  0x63   :  { %1828 = vmatprep.subr.bf16.mxu0 %v2571_v25  ;;  %v2647_v25 = vld [vmem:[#allocation2 + $0x610] ss:$8 sps:$4 sm:$0xff]  }
  0x65   :  { %1665 = vmatpush1.bf16.msra.mxu1 %v2566_v26  ;;  %v48_v26 = vld [vmem:[%s3098_s0 + $0x68] sm:$0xff] }
  0x66   :  { %1829 = vmatpush1.bf16.msra.mxu0 %v2569_v27  ;;  %1666 = vmatprep.subr.bf16.mxu1 %v2574_v28  ;;  %v2652_v27 = vld [vmem:[#allocation2 + $0x224] ss:$8 sps:$4 sm:$0xff]  }
  0x67   :  { %1830 = vmatprep.subr.bf16.mxu0 %v2577_v29  ;;  %v2655_v28 = vld [vmem:[#allocation2 + $0x624] ss:$8 sps:$4 sm:$0xff]   ;;  %v64_v29 = vpack.c.bf16 %v48_v26, %v48_v26  ;;  %v42_v26 = vld [vmem:[%s3098_s0 + $0x38] sm:$0xff] }
  0x69   :  { %1667 = vmatpush1.bf16.msra.mxu1 %v2572_v30  ;;  %v2650_v30 = vld [vmem:[#allocation2 + $0x220] ss:$8 sps:$4 sm:$0xff]  }
  0x6a   :  { %1831 = vmatpush1.bf16.msra.mxu0 %v2575_v31  ;;  %1668 = vmatprep.subr.bf16.mxu1 %v2580_v32  ;;  %v2653_v31 = vld [vmem:[#allocation2 + $0x620] ss:$8 sps:$4 sm:$0xff]   ;;  %v2658_v32 = vld [vmem:[#allocation2 + $0x234] ss:$8 sps:$4 sm:$0xff]  }
  0x6b   :  { %1832 = vmatprep.subr.bf16.mxu0 %v2583_v33  ;;  %v2661_v33 = vld [vmem:[#allocation2 + $0x634] ss:$8 sps:$4 sm:$0xff]  }
  0x6d   :  { %1669 = vmatpush1.bf16.msra.mxu1 %v2578_v35  ;;  %v2659_v35 = vld [vmem:[#allocation2 + $0x630] ss:$8 sps:$4 sm:$0xff]  }
  0x6e   :  { %1833 = vmatpush1.bf16.msra.mxu0 %v2581_v37  ;;  %1670 = vmatprep.subr.bf16.mxu1 %v2586_v39  ;;  %v2667_v37 = vld [vmem:[#allocation2 + $0x644] ss:$8 sps:$4 sm:$0xff]   ;;  %v2665_v39 = vld [vmem:[#allocation2 + $0x640] ss:$8 sps:$4 sm:$0xff]  }
  0x6f   :  { %1834 = vmatprep.subr.bf16.mxu0 %v2589_v40  ;;  %v2670_v40 = vld [vmem:[#allocation2 + $0x254] ss:$8 sps:$4 sm:$0xff]  }
  0x71   :  { %1671 = vmatpush1.bf16.msra.mxu1 %v2584_v42  ;;  %v2668_v42 = vld [vmem:[#allocation2 + $0x250] ss:$8 sps:$4 sm:$0xff]  }
  0x72   :  { %1835 = vmatpush1.bf16.msra.mxu0 %v2587_v43  ;;  %1672 = vmatprep.subr.bf16.mxu1 %v2592_v44  ;;  %v2671_v43 = vld [vmem:[#allocation2 + $0x650] ss:$8 sps:$4 sm:$0xff]   ;;  %v2676_v44 = vld [vmem:[#allocation2 + $0x264] ss:$8 sps:$4 sm:$0xff]  }
  0x73   :  { %1836 = vmatprep.subr.bf16.mxu0 %v2595_v45  ;;  %v2679_v45 = vld [vmem:[#allocation2 + $0x664] ss:$8 sps:$4 sm:$0xff]  }
  0x75   :  { %1673 = vmatpush1.bf16.msra.mxu1 %v2590_v46  ;;  %v2674_v46 = vld [vmem:[#allocation2 + $0x260] ss:$8 sps:$4 sm:$0xff]  }
  0x76   :  { %1837 = vmatpush1.bf16.msra.mxu0 %v2593_v47  ;;  %1674 = vmatprep.subr.bf16.mxu1 %v2598_v48  ;;  %v2677_v47 = vld [vmem:[#allocation2 + $0x660] ss:$8 sps:$4 sm:$0xff]   ;;  %v2682_v48 = vld [vmem:[#allocation2 + $0x274] ss:$8 sps:$4 sm:$0xff]  }
  0x77   :  { %1838 = vmatprep.subr.bf16.mxu0 %v2601_v49  ;;  %v2685_v49 = vld [vmem:[#allocation2 + $0x674] ss:$8 sps:$4 sm:$0xff]  }
  0x79   :  { %1675 = vmatpush1.bf16.msra.mxu1 %v2596_v50  ;;  %v2680_v50 = vld [vmem:[#allocation2 + $0x270] ss:$8 sps:$4 sm:$0xff]  }
  0x7a   :  { %1839 = vmatpush1.bf16.msra.mxu0 %v2599_v51  ;;  %1676 = vmatprep.subr.bf16.mxu1 %v2604_v52  ;;  %v2683_v51 = vld [vmem:[#allocation2 + $0x670] ss:$8 sps:$4 sm:$0xff]   ;;  %v2688_v52 = vld [vmem:[#allocation2 + $0x284] ss:$8 sps:$4 sm:$0xff]  }
  0x7b   :  { %1840 = vmatprep.subr.bf16.mxu0 %v2607_v53  ;;  %v2691_v53 = vld [vmem:[#allocation2 + $0x684] ss:$8 sps:$4 sm:$0xff]  }
  0x7d   :  { %1677 = vmatpush1.bf16.msra.mxu1 %v2602_v54  ;;  %v2686_v54 = vld [vmem:[#allocation2 + $0x280] ss:$8 sps:$4 sm:$0xff]  }
  0x7e   :  { %1841 = vmatpush1.bf16.msra.mxu0 %v2605_v55  ;;  %1678 = vmatprep.subr.bf16.mxu1 %v2610_v56  ;;  %v2689_v55 = vld [vmem:[#allocation2 + $0x680] ss:$8 sps:$4 sm:$0xff]   ;;  %v2694_v56 = vld [vmem:[#allocation2 + $0x294] ss:$8 sps:$4 sm:$0xff]  }
  0x7f   :  { %1842 = vmatprep.subr.bf16.mxu0 %v2613_v57  ;;  %v2697_v57 = vld [vmem:[#allocation2 + $0x694] ss:$8 sps:$4 sm:$0xff]  }
  0x81   :  { %1679 = vmatpush1.bf16.msra.mxu1 %v2608_v58  ;;  %v2692_v58 = vld [vmem:[#allocation2 + $0x290] ss:$8 sps:$4 sm:$0xff]  }
  0x82   :  { %1843 = vmatpush1.bf16.msra.mxu0 %v2611_v59  ;;  %1680 = vmatprep.subr.bf16.mxu1 %v2616_v60  ;;  %v2695_v59 = vld [vmem:[#allocation2 + $0x690] ss:$8 sps:$4 sm:$0xff]   ;;  %v2700_v60 = vld [vmem:[#allocation2 + $0x2a4] ss:$8 sps:$4 sm:$0xff]  }
  0x83   :  { %1844 = vmatprep.subr.bf16.mxu0 %v2619_v61  ;;  %v2703_v61 = vld [vmem:[#allocation2 + $0x6a4] ss:$8 sps:$4 sm:$0xff]  }
  0x85   :  { %1681 = vmatpush1.bf16.msra.mxu1 %v2614_v62  ;;  %v2698_v62 = vld [vmem:[#allocation2 + $0x2a0] ss:$8 sps:$4 sm:$0xff]  }
  0x86   :  { %1845 = vmatpush1.bf16.msra.mxu0 %v2617_v63  ;;  %1682 = vmatprep.subr.bf16.mxu1 %v2622_v0  ;;  %v2701_v63 = vld [vmem:[#allocation2 + $0x6a0] ss:$8 sps:$4 sm:$0xff]   ;;  %v2706_v0 = vld [vmem:[#allocation2 + $0x2b4] ss:$8 sps:$4 sm:$0xff]  }
  0x87   :  { %1846 = vmatprep.subr.bf16.mxu0 %v2625_v1  ;;  %v2709_v1 = vld [vmem:[#allocation2 + $0x6b4] ss:$8 sps:$4 sm:$0xff]  }
  0x89   :  { %1683 = vmatpush1.bf16.msra.mxu1 %v2620_v2  ;;  %v2704_v2 = vld [vmem:[#allocation2 + $0x2b0] ss:$8 sps:$4 sm:$0xff]  }
  0x8a   :  { %1847 = vmatpush1.bf16.msra.mxu0 %v2623_v3  ;;  %1684 = vmatprep.subr.bf16.mxu1 %v2628_v4  ;;  %v2707_v3 = vld [vmem:[#allocation2 + $0x6b0] ss:$8 sps:$4 sm:$0xff]   ;;  %v2712_v4 = vld [vmem:[#allocation2 + $0x2c4] ss:$8 sps:$4 sm:$0xff]  }
  0x8b   :  { %1848 = vmatprep.subr.bf16.mxu0 %v2631_v5  ;;  %v2715_v5 = vld [vmem:[#allocation2 + $0x6c4] ss:$8 sps:$4 sm:$0xff]  }
  0x8d   :  { %1685 = vmatpush1.bf16.msra.mxu1 %v2626_v6  ;;  %v2710_v6 = vld [vmem:[#allocation2 + $0x2c0] ss:$8 sps:$4 sm:$0xff]  }
  0x8e   :  { %1849 = vmatpush1.bf16.msra.mxu0 %v2629_v7  ;;  %1686 = vmatprep.subr.bf16.mxu1 %v2634_v8  ;;  %v2713_v7 = vld [vmem:[#allocation2 + $0x6c0] ss:$8 sps:$4 sm:$0xff]   ;;  %v2718_v8 = vld [vmem:[#allocation2 + $0x2d4] ss:$8 sps:$4 sm:$0xff]  }
  0x8f   :  { %1850 = vmatprep.subr.bf16.mxu0 %v2637_v9  ;;  %v2721_v9 = vld [vmem:[#allocation2 + $0x6d4] ss:$8 sps:$4 sm:$0xff]  }
  0x91   :  { %1687 = vmatpush1.bf16.msra.mxu1 %v2632_v10  ;;  %v2716_v10 = vld [vmem:[#allocation2 + $0x2d0] ss:$8 sps:$4 sm:$0xff]  }
  0x92   :  { %1851 = vmatpush1.bf16.msra.mxu0 %v2635_v11  ;;  %1697 = vmatprep.subr.bf16.mxu1 %v2640_v12  ;;  %v2719_v11 = vld [vmem:[#allocation2 + $0x6d0] ss:$8 sps:$4 sm:$0xff]   ;;  %v2724_v12 = vld [vmem:[#allocation2 + $0x2e4] ss:$8 sps:$4 sm:$0xff]  }
  0x93   :  { %1861 = vmatprep.subr.bf16.mxu0 %v2643_v15  ;;  %v2725_v15 = vld [vmem:[#allocation2 + $0x6e0] ss:$8 sps:$4 sm:$0xff]  }
  0x94   :  { %1689 = vmatmul.mubr.bf16.vlgmr.msra.gmra.mrb[0].mxu1 %v53_v18  ;;  %v2728_v18 = vld [vmem:[#allocation2 + $0x2f0] ss:$8 sps:$4 sm:$0xff]  }
  0x95   :  { %1853 = vmatmul.mubr.bf16.vlgmr.msra.gmra.mrb[0].mxu0 %v61_v19  ;;  %1698 = vmatpush1.bf16.msra.mxu1 %v2638_v16  ;;  %v2730_v16 = vld [vmem:[#allocation2 + $0x2f4] ss:$8 sps:$4 sm:$0xff]   ;;  %v2731_v19 = vld [vmem:[#allocation2 + $0x6f0] ss:$8 sps:$4 sm:$0xff]  }
  0x96   :  { %1862 = vmatpush1.bf16.msra.mxu0 %v2641_v17  ;;  %1699 = vmatprep.subr.bf16.mxu1 %v2646_v20  ;;  %v2733_v17 = vld [vmem:[#allocation2 + $0x6f4] ss:$8 sps:$4 sm:$0xff]   ;;  %v39_v20 = vld [vmem:[%s3098_s0 + $0x20] sm:$0xff] }
  0x97   :  { %1863 = vmatprep.subr.bf16.mxu0 %v2649_v21  ;;  %1729 = vmatprep.mubr.bf16.mxu1 %v56_v24  ;;  %v47_v21 = vld [vmem:[%s3098_s0 + $0x60] sm:$0xff]  ;;  %v55_v24 = vpack.c.bf16 %v39_v20, %v39_v20 }
  0x98   :  { %1893 = vmatprep.mubr.bf16.mxu0 %v64_v29  ;;  %v2737_v29 = vld [vmem:[#allocation2 + $0x700] ss:$8 sps:$4 sm:$0xff]   ;;  %v2820_v20 = vld [vmem:[#allocation2 + $0x3e4] ss:$8 sps:$4 sm:$0xff]  }
  0x99   :  { %1700 = vmatpush1.bf16.msra.mxu1 %v2644_v23  ;;  %v2739_v23 = vld [vmem:[#allocation2 + $0x704] ss:$8 sps:$4 sm:$0xff]  }
  0x9a   :  { %1864 = vmatpush1.bf16.msra.mxu0 %v2647_v25  ;;  %1701 = vmatprep.subr.bf16.mxu1 %v2652_v27  ;;  %v63_v25 = vpack.c.bf16 %v47_v21, %v47_v21  ;;  %v50_v27 = vld [vmem:[%s3098_s0 + $0x78] sm:$0xff]  ;;  %v2823_v21 = vld [vmem:[#allocation2 + $0x7e4] ss:$8 sps:$4 sm:$0xff]  }
  0x9b   :  { %1865 = vmatprep.subr.bf16.mxu0 %v2655_v28  ;;  %v2734_v28 = vld [vmem:[#allocation2 + $0x300] ss:$8 sps:$4 sm:$0xff]  }
  0x9d   :  { %1702 = vmatpush1.bf16.msra.mxu1 %v2650_v30  ;;  %v2742_v30 = vld [vmem:[#allocation2 + $0x314] ss:$8 sps:$4 sm:$0xff]  }
  0x9e   :  { %1866 = vmatpush1.bf16.msra.mxu0 %v2653_v31  ;;  %1703 = vmatprep.subr.bf16.mxu1 %v2658_v32  ;;  %v2745_v31 = vld [vmem:[#allocation2 + $0x714] ss:$8 sps:$4 sm:$0xff]   ;;  %v58_v32 = vpack.c.bf16 %v42_v26, %v42_v26  ;;  %v2824_v26 = vld [vmem:[#allocation2 + $0x3f0] ss:$8 sps:$4 sm:$0xff]  }
  0x9f   :  { %1867 = vmatprep.subr.bf16.mxu0 %v2661_v33  ;;  %v66_v33 = vpack.c.bf16 %v50_v27, %v50_v27  ;;  %v2827_v27 = vld [vmem:[#allocation2 + $0x7f0] ss:$8 sps:$4 sm:$0xff]  }
  0xa1   :  { %1704 = vmatpush1.bf16.msra.mxu1 %v2656_v34  ;;  %v2740_v34 = vld [vmem:[#allocation2 + $0x310] ss:$8 sps:$4 sm:$0xff]  }
  0xa2   :  { %1868 = vmatpush1.bf16.msra.mxu0 %v2659_v35  ;;  %1705 = vmatprep.subr.bf16.mxu1 %v2664_v36  ;;  %v2743_v35 = vld [vmem:[#allocation2 + $0x710] ss:$8 sps:$4 sm:$0xff]   ;;  %v2748_v36 = vld [vmem:[#allocation2 + $0x324] ss:$8 sps:$4 sm:$0xff]  }
  0xa3   :  { %1869 = vmatprep.subr.bf16.mxu0 %v2667_v37  ;;  %v2751_v37 = vld [vmem:[#allocation2 + $0x724] ss:$8 sps:$4 sm:$0xff]  }
  0xa5   :  { %1706 = vmatpush1.bf16.msra.mxu1 %v2662_v38  ;;  %v2746_v38 = vld [vmem:[#allocation2 + $0x320] ss:$8 sps:$4 sm:$0xff]  }
  0xa6   :  { %1870 = vmatpush1.bf16.msra.mxu0 %v2665_v39  ;;  %1707 = vmatprep.subr.bf16.mxu1 %v2670_v40  ;;  %v2749_v39 = vld [vmem:[#allocation2 + $0x720] ss:$8 sps:$4 sm:$0xff]   ;;  %v2754_v40 = vld [vmem:[#allocation2 + $0x334] ss:$8 sps:$4 sm:$0xff]  }
  0xa7   :  { %1871 = vmatprep.subr.bf16.mxu0 %v2673_v41  ;;  %v2757_v41 = vld [vmem:[#allocation2 + $0x734] ss:$8 sps:$4 sm:$0xff]  }
  0xa9   :  { %1708 = vmatpush1.bf16.msra.mxu1 %v2668_v42  ;;  %v2752_v42 = vld [vmem:[#allocation2 + $0x330] ss:$8 sps:$4 sm:$0xff]  }
  0xaa   :  { %1872 = vmatpush1.bf16.msra.mxu0 %v2671_v43  ;;  %1709 = vmatprep.subr.bf16.mxu1 %v2676_v44  ;;  %v2755_v43 = vld [vmem:[#allocation2 + $0x730] ss:$8 sps:$4 sm:$0xff]   ;;  %v2760_v44 = vld [vmem:[#allocation2 + $0x344] ss:$8 sps:$4 sm:$0xff]  }
  0xab   :  { %1873 = vmatprep.subr.bf16.mxu0 %v2679_v45  ;;  %v2763_v45 = vld [vmem:[#allocation2 + $0x744] ss:$8 sps:$4 sm:$0xff]  }
  0xad   :  { %1710 = vmatpush1.bf16.msra.mxu1 %v2674_v46  ;;  %v2758_v46 = vld [vmem:[#allocation2 + $0x340] ss:$8 sps:$4 sm:$0xff]  }
  0xae   :  { %1874 = vmatpush1.bf16.msra.mxu0 %v2677_v47  ;;  %1711 = vmatprep.subr.bf16.mxu1 %v2682_v48  ;;  %v2761_v47 = vld [vmem:[#allocation2 + $0x740] ss:$8 sps:$4 sm:$0xff]   ;;  %v2766_v48 = vld [vmem:[#allocation2 + $0x354] ss:$8 sps:$4 sm:$0xff]  }
  0xaf   :  { %1875 = vmatprep.subr.bf16.mxu0 %v2685_v49  ;;  %v2769_v49 = vld [vmem:[#allocation2 + $0x754] ss:$8 sps:$4 sm:$0xff]  }
  0xb1   :  { %1712 = vmatpush1.bf16.msra.mxu1 %v2680_v50  ;;  %v2764_v50 = vld [vmem:[#allocation2 + $0x350] ss:$8 sps:$4 sm:$0xff]  }
  0xb2   :  { %1876 = vmatpush1.bf16.msra.mxu0 %v2683_v51  ;;  %1713 = vmatprep.subr.bf16.mxu1 %v2688_v52  ;;  %v2767_v51 = vld [vmem:[#allocation2 + $0x750] ss:$8 sps:$4 sm:$0xff]   ;;  %v2772_v52 = vld [vmem:[#allocation2 + $0x364] ss:$8 sps:$4 sm:$0xff]  }
  0xb3   :  { %1877 = vmatprep.subr.bf16.mxu0 %v2691_v53  ;;  %v2775_v53 = vld [vmem:[#allocation2 + $0x764] ss:$8 sps:$4 sm:$0xff]  }
  0xb5   :  { %1714 = vmatpush1.bf16.msra.mxu1 %v2686_v54  ;;  %v2770_v54 = vld [vmem:[#allocation2 + $0x360] ss:$8 sps:$4 sm:$0xff]  }
  0xb6   :  { %1878 = vmatpush1.bf16.msra.mxu0 %v2689_v55  ;;  %1715 = vmatprep.subr.bf16.mxu1 %v2694_v56  ;;  %v2773_v55 = vld [vmem:[#allocation2 + $0x760] ss:$8 sps:$4 sm:$0xff]   ;;  %v2778_v56 = vld [vmem:[#allocation2 + $0x374] ss:$8 sps:$4 sm:$0xff]  }
  0xb7   :  { %1879 = vmatprep.subr.bf16.mxu0 %v2697_v57  ;;  %v2781_v57 = vld [vmem:[#allocation2 + $0x774] ss:$8 sps:$4 sm:$0xff]  }
  0xb9   :  { %1716 = vmatpush1.bf16.msra.mxu1 %v2692_v58  ;;  %v2776_v58 = vld [vmem:[#allocation2 + $0x370] ss:$8 sps:$4 sm:$0xff]  }
  0xba   :  { %1880 = vmatpush1.bf16.msra.mxu0 %v2695_v59  ;;  %1717 = vmatprep.subr.bf16.mxu1 %v2700_v60  ;;  %v2779_v59 = vld [vmem:[#allocation2 + $0x770] ss:$8 sps:$4 sm:$0xff]   ;;  %v2784_v60 = vld [vmem:[#allocation2 + $0x384] ss:$8 sps:$4 sm:$0xff]  }
  0xbb   :  { %1881 = vmatprep.subr.bf16.mxu0 %v2703_v61  ;;  %v2787_v61 = vld [vmem:[#allocation2 + $0x784] ss:$8 sps:$4 sm:$0xff]  }
  0xbd   :  { %1718 = vmatpush1.bf16.msra.mxu1 %v2698_v62  ;;  %v2782_v62 = vld [vmem:[#allocation2 + $0x380] ss:$8 sps:$4 sm:$0xff]  }
  0xbe   :  { %1882 = vmatpush1.bf16.msra.mxu0 %v2701_v63  ;;  %1719 = vmatprep.subr.bf16.mxu1 %v2706_v0  ;;  %v2785_v63 = vld [vmem:[#allocation2 + $0x780] ss:$8 sps:$4 sm:$0xff]   ;;  %v2790_v0 = vld [vmem:[#allocation2 + $0x394] ss:$8 sps:$4 sm:$0xff]  }
  0xbf   :  { %1883 = vmatprep.subr.bf16.mxu0 %v2709_v1  ;;  %v2793_v1 = vld [vmem:[#allocation2 + $0x794] ss:$8 sps:$4 sm:$0xff]  }
  0xc1   :  { %1720 = vmatpush1.bf16.msra.mxu1 %v2704_v2  ;;  %v2788_v2 = vld [vmem:[#allocation2 + $0x390] ss:$8 sps:$4 sm:$0xff]  }
  0xc2   :  { %1884 = vmatpush1.bf16.msra.mxu0 %v2707_v3  ;;  %1721 = vmatprep.subr.bf16.mxu1 %v2712_v4  ;;  %v2791_v3 = vld [vmem:[#allocation2 + $0x790] ss:$8 sps:$4 sm:$0xff]   ;;  %v2796_v4 = vld [vmem:[#allocation2 + $0x3a4] ss:$8 sps:$4 sm:$0xff]  }
  0xc3   :  { %1885 = vmatprep.subr.bf16.mxu0 %v2715_v5  ;;  %v2799_v5 = vld [vmem:[#allocation2 + $0x7a4] ss:$8 sps:$4 sm:$0xff]  }
  0xc5   :  { %1722 = vmatpush1.bf16.msra.mxu1 %v2710_v6  ;;  %v2794_v6 = vld [vmem:[#allocation2 + $0x3a0] ss:$8 sps:$4 sm:$0xff]  }
  0xc6   :  { %1886 = vmatpush1.bf16.msra.mxu0 %v2713_v7  ;;  %1723 = vmatprep.subr.bf16.mxu1 %v2718_v8  ;;  %v2797_v7 = vld [vmem:[#allocation2 + $0x7a0] ss:$8 sps:$4 sm:$0xff]   ;;  %v2802_v8 = vld [vmem:[#allocation2 + $0x3b4] ss:$8 sps:$4 sm:$0xff]  }
  0xc7   :  { %1887 = vmatprep.subr.bf16.mxu0 %v2721_v9  ;;  %v2805_v9 = vld [vmem:[#allocation2 + $0x7b4] ss:$8 sps:$4 sm:$0xff]  }
  0xc9   :  { %1724 = vmatpush1.bf16.msra.mxu1 %v2716_v10  ;;  %v2800_v10 = vld [vmem:[#allocation2 + $0x3b0] ss:$8 sps:$4 sm:$0xff]  }
  0xca   :  { %1888 = vmatpush1.bf16.msra.mxu0 %v2719_v11  ;;  %1725 = vmatprep.subr.bf16.mxu1 %v2724_v12  ;;  %v2803_v11 = vld [vmem:[#allocation2 + $0x7b0] ss:$8 sps:$4 sm:$0xff]   ;;  %v2808_v12 = vld [vmem:[#allocation2 + $0x3c4] ss:$8 sps:$4 sm:$0xff]  }
  0xcb   :  { %1889 = vmatprep.subr.bf16.mxu0 %v2727_v13  ;;  %v2811_v13 = vld [vmem:[#allocation2 + $0x7c4] ss:$8 sps:$4 sm:$0xff]  }
  0xcd   :  { %1726 = vmatpush1.bf16.msra.mxu1 %v2722_v14  ;;  %v2806_v14 = vld [vmem:[#allocation2 + $0x3c0] ss:$8 sps:$4 sm:$0xff]  }
  0xce   :  { %1890 = vmatpush1.bf16.msra.mxu0 %v2725_v15  ;;  %1727 = vmatprep.subr.bf16.mxu1 %v2730_v16  ;;  %v2809_v15 = vld [vmem:[#allocation2 + $0x7c0] ss:$8 sps:$4 sm:$0xff]   ;;  %v2814_v16 = vld [vmem:[#allocation2 + $0x3d4] ss:$8 sps:$4 sm:$0xff]  }
  0xcf   :  { %1891 = vmatprep.subr.bf16.mxu0 %v2733_v17  ;;  %v2817_v17 = vld [vmem:[#allocation2 + $0x7d4] ss:$8 sps:$4 sm:$0xff]  }
  0xd1   :  { %1728 = vmatpush1.bf16.msra.mxu1 %v2728_v18  ;;  %v2812_v18 = vld [vmem:[#allocation2 + $0x3d0] ss:$8 sps:$4 sm:$0xff]  }
  0xd2   :  { %1892 = vmatpush1.bf16.msra.mxu0 %v2731_v19  ;;  %1738 = vmatprep.subr.bf16.mxu1 %v2736_v22  ;;  %v2815_v19 = vld [vmem:[#allocation2 + $0x7d0] ss:$8 sps:$4 sm:$0xff]   ;;  %v2818_v22 = vld [vmem:[#allocation2 + $0x3e0] ss:$8 sps:$4 sm:$0xff]  }
  0xd3   :  { %1902 = vmatprep.subr.bf16.mxu0 %v2739_v23  ;;  %v2821_v23 = vld [vmem:[#allocation2 + $0x7e0] ss:$8 sps:$4 sm:$0xff]  }
  0xd4   :  { %1730 = vmatmul.mubr.bf16.vlgmr.msra.gmra.mrb[0].mxu1 %v55_v24  ;;  %v2826_v24 = vld [vmem:[#allocation2 + $0x3f4] ss:$8 sps:$4 sm:$0xff]  }
  0xd5   :  { %1894 = vmatmul.mubr.bf16.vlgmr.msra.gmra.mrb[0].mxu0 %v63_v25  ;;  %1739 = vmatpush1.bf16.msra.mxu1 %v2734_v28  ;;  %v2829_v25 = vld [vmem:[#allocation2 + $0x7f4] ss:$8 sps:$4 sm:$0xff]  }
  0xd6   :  { %1903 = vmatpush1.bf16.msra.mxu0 %v2737_v29  ;;  %1740 = vmatprep.subr.bf16.mxu1 %v2742_v30  ;;  %v41_v28 = vld [vmem:[%s3098_s0 + $0x30] sm:$0xff] }
  0xd7   :  { %1904 = vmatprep.subr.bf16.mxu0 %v2745_v31  ;;  %1770 = vmatprep.mubr.bf16.mxu1 %v58_v32  ;;  %v49_v29 = vld [vmem:[%s3098_s0 + $0x70] sm:$0xff]  ;;  %v57_v30 = vpack.c.bf16 %v41_v28, %v41_v28  ;;  %v1971_v32 = vld [vmem:[%s3101_s3 + $0x80] sm:$0xff] }
  0xd8   :  { %1934 = vmatprep.mubr.bf16.mxu0 %v66_v33  ;;  %v65_v31 = vpack.c.bf16 %v49_v29, %v49_v29  ;;  %v1972_v33 = vld [vmem:[%s3101_s3 + $0x88] sm:$0xff] }
  0xd9   :  { %1741 = vmatpush1.bf16.msra.mxu1 %v2740_v34  ;;  %v2382_v34 = vpack.c.bf16 %v1972_v33, %v1971_v32 }
  0xda   :  { %1905 = vmatpush1.bf16.msra.mxu0 %v2743_v35  ;;  %1742 = vmatprep.subr.bf16.mxu1 %v2748_v36  ;;  %v1955_v35 = vld [vmem:[%s3101_s3] sm:$0xff]  ;;  %v1956_v36 = vld [vmem:[%s3101_s3 + $0x8] sm:$0xff] }
  0xdb   :  { %1906 = vmatprep.subr.bf16.mxu0 %v2751_v37  ;;  %v2384_v37 = vpack.c.bf16 %v1956_v36, %v1955_v35 }
  0xdd   :  { %1743 = vmatpush1.bf16.msra.mxu1 %v2746_v38  ;;  %v1973_v38 = vld [vmem:[%s3101_s3 + $0x90] sm:$0xff] }
  0xde   :  { %1907 = vmatpush1.bf16.msra.mxu0 %v2749_v39  ;;  %1744 = vmatprep.subr.bf16.mxu1 %v2754_v40  ;;  %v1974_v39 = vld [vmem:[%s3101_s3 + $0x98] sm:$0xff] }
  0xdf   :  { %1908 = vmatprep.subr.bf16.mxu0 %v2757_v41  ;;  %v2386_v40 = vpack.c.bf16 %v1974_v39, %v1973_v38  ;;  %v1957_v41 = vld [vmem:[%s3101_s3 + $0x10] sm:$0xff] }
  0xe1   :  { %1745 = vmatpush1.bf16.msra.mxu1 %v2752_v42  ;;  %v1958_v42 = vld [vmem:[%s3101_s3 + $0x18] sm:$0xff] }
  0xe2   :  { %1909 = vmatpush1.bf16.msra.mxu0 %v2755_v43  ;;  %1746 = vmatprep.subr.bf16.mxu1 %v2760_v44  ;;  %v2388_v43 = vpack.c.bf16 %v1958_v42, %v1957_v41  ;;  %v1975_v44 = vld [vmem:[%s3101_s3 + $0xa0] sm:$0xff] }
  0xe3   :  { %1910 = vmatprep.subr.bf16.mxu0 %v2763_v45  ;;  %v1976_v45 = vld [vmem:[%s3101_s3 + $0xa8] sm:$0xff] }
  0xe5   :  { %1747 = vmatpush1.bf16.msra.mxu1 %v2758_v46  ;;  %v2390_v46 = vpack.c.bf16 %v1976_v45, %v1975_v44  ;;  %v2345_v44 = vld [vmem:[%s3102_s4] ss:$0 sm:$0xff] }
  0xe6   :  { %1911 = vmatpush1.bf16.msra.mxu0 %v2761_v47  ;;  %1748 = vmatprep.subr.bf16.mxu1 %v2766_v48  ;;  %v1959_v47 = vld [vmem:[%s3101_s3 + $0x20] sm:$0xff]  ;;  %v1960_v48 = vld [vmem:[%s3101_s3 + $0x28] sm:$0xff] }
  0xe7   :  { %1912 = vmatprep.subr.bf16.mxu0 %v2769_v49  ;;  %v2392_v49 = vpack.c.bf16 %v1960_v48, %v1959_v47 }
  0xe9   :  { %1749 = vmatpush1.bf16.msra.mxu1 %v2764_v50  ;;  %v1977_v50 = vld [vmem:[%s3101_s3 + $0xb0] sm:$0xff] }
  0xea   :  { %1913 = vmatpush1.bf16.msra.mxu0 %v2767_v51  ;;  %1750 = vmatprep.subr.bf16.mxu1 %v2772_v52  ;;  %v1978_v51 = vld [vmem:[%s3101_s3 + $0xb8] sm:$0xff] }
  0xeb   :  { %1914 = vmatprep.subr.bf16.mxu0 %v2775_v53  ;;  %v2394_v52 = vpack.c.bf16 %v1978_v51, %v1977_v50  ;;  %v1961_v53 = vld [vmem:[%s3101_s3 + $0x30] sm:$0xff] }
  0xed   :  { %1751 = vmatpush1.bf16.msra.mxu1 %v2770_v54  ;;  %v1962_v54 = vld [vmem:[%s3101_s3 + $0x38] sm:$0xff] }
  0xee   :  { %1915 = vmatpush1.bf16.msra.mxu0 %v2773_v55  ;;  %1752 = vmatprep.subr.bf16.mxu1 %v2778_v56  ;;  %v2396_v55 = vpack.c.bf16 %v1962_v54, %v1961_v53  ;;  %v1979_v56 = vld [vmem:[%s3101_s3 + $0xc0] sm:$0xff] }
  0xef   :  { %1916 = vmatprep.subr.bf16.mxu0 %v2781_v57  ;;  %v1980_v57 = vld [vmem:[%s3101_s3 + $0xc8] sm:$0xff] }
  0xf1   :  { %1753 = vmatpush1.bf16.msra.mxu1 %v2776_v58  ;;  %v2398_v58 = vpack.c.bf16 %v1980_v57, %v1979_v56 }
  0xf2   :  { %1917 = vmatpush1.bf16.msra.mxu0 %v2779_v59  ;;  %1754 = vmatprep.subr.bf16.mxu1 %v2784_v60  ;;  %v1963_v59 = vld [vmem:[%s3101_s3 + $0x40] sm:$0xff]  ;;  %v1964_v60 = vld [vmem:[%s3101_s3 + $0x48] sm:$0xff] }
  0xf3   :  { %1918 = vmatprep.subr.bf16.mxu0 %v2787_v61  ;;  %v2400_v61 = vpack.c.bf16 %v1964_v60, %v1963_v59 }
  0xf5   :  { %1755 = vmatpush1.bf16.msra.mxu1 %v2782_v62  ;;  %v1981_v62 = vld [vmem:[%s3101_s3 + $0xd0] sm:$0xff] }
  0xf6   :  { %1919 = vmatpush1.bf16.msra.mxu0 %v2785_v63  ;;  %1756 = vmatprep.subr.bf16.mxu1 %v2790_v0  ;;  %v1982_v63 = vld [vmem:[%s3101_s3 + $0xd8] sm:$0xff] }
  0xf7   :  { %1920 = vmatprep.subr.bf16.mxu0 %v2793_v1  ;;  %v2402_v0 = vpack.c.bf16 %v1982_v63, %v1981_v62  ;;  %v1965_v1 = vld [vmem:[%s3101_s3 + $0x50] sm:$0xff] }
  0xf9   :  { %1757 = vmatpush1.bf16.msra.mxu1 %v2788_v2  ;;  %v1966_v2 = vld [vmem:[%s3101_s3 + $0x58] sm:$0xff] }
  0xfa   :  { %1921 = vmatpush1.bf16.msra.mxu0 %v2791_v3  ;;  %1758 = vmatprep.subr.bf16.mxu1 %v2796_v4  ;;  %v2404_v3 = vpack.c.bf16 %v1966_v2, %v1965_v1  ;;  %v1983_v4 = vld [vmem:[%s3101_s3 + $0xe0] sm:$0xff] }
  0xfb   :  { %1922 = vmatprep.subr.bf16.mxu0 %v2799_v5  ;;  %v1984_v5 = vld [vmem:[%s3101_s3 + $0xe8] sm:$0xff] }
  0xfd   :  { %1759 = vmatpush1.bf16.msra.mxu1 %v2794_v6  ;;  %v1967_v6 = vld [vmem:[%s3101_s3 + $0x60] sm:$0xff] }
  0xfe   :  { %1923 = vmatpush1.bf16.msra.mxu0 %v2797_v7  ;;  %1760 = vmatprep.subr.bf16.mxu1 %v2802_v8  ;;  %v2406_v7 = vpack.c.bf16 %v1984_v5, %v1983_v4  ;;  %v1968_v8 = vld [vmem:[%s3101_s3 + $0x68] sm:$0xff] }
  0xff   :  { %1924 = vmatprep.subr.bf16.mxu0 %v2805_v9  ;;  %v1985_v9 = vld [vmem:[%s3101_s3 + $0xf0] sm:$0xff] }
 0x101   :  { %1761 = vmatpush1.bf16.msra.mxu1 %v2800_v10  ;;  %v1986_v10 = vld [vmem:[%s3101_s3 + $0xf8] sm:$0xff] }
 0x102   :  { %1925 = vmatpush1.bf16.msra.mxu0 %v2803_v11  ;;  %1762 = vmatprep.subr.bf16.mxu1 %v2808_v12  ;;  %v2408_v11 = vpack.c.bf16 %v1968_v8, %v1967_v6  ;;  %v2410_v12 = vpack.c.bf16 %v1986_v10, %v1985_v9 }
 0x103   :  { %1926 = vmatprep.subr.bf16.mxu0 %v2811_v13  ;;  %v1969_v13 = vld [vmem:[%s3101_s3 + $0x70] sm:$0xff] }
 0x105   :  { %1763 = vmatpush1.bf16.msra.mxu1 %v2806_v14  ;;  %v1970_v14 = vld [vmem:[%s3101_s3 + $0x78] sm:$0xff] }
 0x106   :  { %1927 = vmatpush1.bf16.msra.mxu0 %v2809_v15  ;;  %1764 = vmatprep.subr.bf16.mxu1 %v2814_v16  ;;  %v2412_v15 = vpack.c.bf16 %v1970_v14, %v1969_v13  ;;  %v325_v16 = vlaneseq }
 0x107   :  { %1928 = vmatprep.subr.bf16.mxu0 %v2817_v17 }
 0x108   :  { %v326_v17 = vshrl.u32 %v325_v16, 7 }
 0x109   :  { %1765 = vmatpush1.bf16.msra.mxu1 %v2812_v18 }
 0x10a   :  { %1929 = vmatpush1.bf16.msra.mxu0 %v2815_v19  ;;  %1766 = vmatprep.subr.bf16.mxu1 %v2820_v20  ;;  %v327_v18 = vsub.s32 0, %v326_v17  ;;  %v323_v19 = vld [vmem:[%s3100_s2] sm:$0x3]  ;;  %v331_v20 = vsub.s32 1, %v326_v17 }
 0x10b   :  { %1930 = vmatprep.subr.bf16.mxu0 %v2823_v21 }
 0x10c   :  { %v328_v21 = vrot.slane %v323_v19, %v327_v18 }
 0x10d   :  { %1767 = vmatpush1.bf16.msra.mxu1 %v2818_v22  ;;  %v332_v22 = vrot.slane %v323_v19, %v331_v20 }
 0x10e   :  { %1931 = vmatpush1.bf16.msra.mxu0 %v2821_v23  ;;  %1768 = vmatprep.subr.bf16.mxu1 %v2826_v24 }
 0x10f   :  { %1932 = vmatprep.subr.bf16.mxu0 %v2829_v25 }
 0x111   :  { %1769 = vmatpush1.bf16.msra.mxu1 %v2824_v26 }
 0x112   :  { %1933 = vmatpush1.bf16.msra.mxu0 %v2827_v27  ;;  %2383 = vmatprep.subr.bf16.mxu1 %v2382_v34 }
 0x114   :  { %1771 = vmatmul.mubr.bf16.vlgmr.msra.gmra.mrb[0].mxu1 %v57_v30 }
 0x115   :  { %1935 = vmatmul.mubr.bf16.vlgmr.msra.gmra.mrb[0].mxu0 %v65_v31  ;;  %2385 = vmatpush3.bf16.msra.mxu1 %v2384_v37 }
 0x116   :  { %2387 = vmatprep.subr.bf16.mxu1 %v2386_v40 }
 0x119   :  { %2389 = vmatpush3.bf16.msra.mxu1 %v2388_v43 }
 0x11a   :  { %2391 = vmatprep.subr.bf16.mxu1 %v2390_v46 }
 0x11d   :  { %2393 = vmatpush3.bf16.msra.mxu1 %v2392_v49 }
 0x11e   :  { %2395 = vmatprep.subr.bf16.mxu1 %v2394_v52 }
 0x121   :  { %2397 = vmatpush3.bf16.msra.mxu1 %v2396_v55 }
 0x122   :  { %2399 = vmatprep.subr.bf16.mxu1 %v2398_v58 }
 0x125   :  { %2401 = vmatpush3.bf16.msra.mxu1 %v2400_v61 }
 0x126   :  { %2403 = vmatprep.subr.bf16.mxu1 %v2402_v0 }
 0x129   :  { %2405 = vmatpush3.bf16.msra.mxu1 %v2404_v3 }
 0x12a   :  { %2407 = vmatprep.subr.bf16.mxu1 %v2406_v7 }
 0x12d   :  { %2409 = vmatpush3.bf16.msra.mxu1 %v2408_v11 }
 0x12e   :  { %2411 = vmatprep.subr.bf16.mxu1 %v2410_v12 }
 0x131   :  { %2413 = vmatpush3.bf16.msra.mxu1 %v2412_v15 }
 0x1e7   :  { %v1772_v23 = vpop.f32.mrb[0].mxu1 }
 0x1e8   :  { %v1936_v24 = vpop.f32.mrb[0].mxu0  ;;  %v2414_v25 = vadd.f32 %v1772_v23, %v328_v21  ;;  %v1774_v26 = vpop.f32.mrb[1].mxu1 }
 0x1e9   :  { %v1938_v27 = vpop.f32.mrb[1].mxu0  ;;  %v2416_v28 = vadd.f32 %v1774_v26, %v332_v22  ;;  %v1776_v29 = vpop.f32.mrb[2].mxu1 }
 0x1ea   :  { %v1940_v30 = vpop.f32.mrb[2].mxu0  ;;  %v2415_v31 = vadd.f32 %v2414_v25, %v1936_v24  ;;  %v1777_v32 = vpop.f32.mrb[3].mxu1 }
 0x1eb   :  { %v1941_v33 = vpop.f32.mrb[3].mxu0  ;;  %v2417_v34 = vadd.f32 %v2416_v28, %v1938_v27 }
 0x1ec   :  { %v2343_v35 = vmul.f32 -1.442695, %v2415_v31 }
 0x1ed   :  { %v2344_v36 = vmul.f32 -1.442695, %v2417_v34 }
 0x1ee   :  { %2830 = vpow2.f32 %v2343_v35 }
 0x1ef   :  { %2832 = vpow2.f32 %v2344_v36 }
 0x1f8   :  { %v2831_v37 = vpop.eup %2830 }
 0x1f9   :  { %v2833_v38 = vpop.eup %2832  ;;  %v1949_v39 = vadd.f32 1.0, %v2831_v37 }
 0x1fa   :  { %v1950_v40 = vadd.f32 1.0, %v2833_v38 }
 0x1fc   :  { %2834 = vrcp.f32 %v1950_v40 }
 0x1fd   :  { %2836 = vrcp.f32 %v1949_v39 }
 0x206   :  { %v2835_v41 = vpop.eup %2834 }
 0x207   :  { %v2837_v42 = vpop.eup %2836  ;;  %2058 = vmatprep.mubr.f32.mxu1 %v2835_v41 }
 0x208   :  { %2059 = vmatmul.mubr.f32.vlgmr.msra.gmra.mrb[4].mxu1 %v2837_v42 }
 0x2db   :  { %v2379_v43 = vpop.f32.mrb[4].mxu1 }
 0x2dc   :  { %v2380_v45 = vpop.f32.mrb[5].mxu1 }
 0x2dd   :  { %v2381_v46 = vadd.f32 %v2380_v45, %v2379_v43 }
 0x2df   :  { %v2061_v47 = vadd.f32 %v2381_v46, %v2345_v44 }
 0x2e1   :  { %v2346_v48 = vmul.f32 -1.442695, %v2061_v47 }
 0x2e3   :  { %2838 = vpow2.f32 %v2346_v48 }
 0x2ed   :  { %v2839_v49 = vpop.eup %2838 }
 0x2ee   :  { %v2067_v50 = vadd.f32 1.0, %v2839_v49 }
 0x2f0   :  { %2840 = vrcp.f32 %v2067_v50 }
 0x2fa   :  { %v2841_v51 = vpop.eup %2840 }
 0x2fb   :  { %2071 = vst.msk [vmem:[#allocation5] sm:$0xff] %vm2070_vm0, %v2841_v51 }
 0x2fc   :  { %2875 = shalt.err (!%p2872_p12)
}
 0x2fd   :  { %s2876_s27 = scalar_lea.hbm %s3103_s5, 128 }
 0x2fe   :  { %p2877_p13 = scmp.ne.s32.totalorder %s3103_s5, %s2876_s27  ;;  %p2880_p0 = scmp.lt.u32.totalorder %s2876_s27, %s3103_s5 }
 0x300   :  { %p2882_p1 = pnand %p2880_p0, %p2877_p13 }
 0x302   :  { %2885 = shalt.err (!%p2882_p1)
}
 0x303   :  { %2081 = dma.vmem_to_hbm [thread:$0]  %s2079_s24, 128, %s3103_s5, [#allocation4]  }
 0x304   :  { %2888 = dma.done.wait [#allocation4], 128  }
 0x305   :  { %2889 = vsyncadd [#allocation4], 4294967168 }
 0x306   :  { %2085 = vsyncpa [#allocation3], 1 }
 0x307   :  { %2086 = vsyncpa [#allocation4], 1 }

</bundles_post_ra>
